<compile_context>
chip_gen: v7x
topology: tpu7x:2x2x1
jax: 0.10.0
libtpu: 0.0.40
codegen_flags: <defaults>
</compile_context>

<pallas_src>
import functools
import numpy as np

import jax
import jax.numpy as jnp
from jax import lax
from jax.experimental import pallas as pl
from jax.experimental.pallas import tpu as pltpu

ITEM_MAX_LEN = 50
USER_MAX_LEN = 50

# 48 MiB scoped-VMEM budget: safe on v5e/v6e (128 MiB physical) and leaves
# headroom on v7x (64 MiB physical per TensorCore).
_VMEM_LIMIT = 48 * 1024 * 1024
_NEG = -1e30          # time padding / softmax mask value


def _round_up(x, d):
    return ((x + d - 1) // d) * d


def _pad_to(a, shape):
    pads = [(0, s - d) for d, s in zip(a.shape, shape)]
    if all(p == (0, 0) for p in pads):
        return a
    return jnp.pad(a, pads)


# ---------------------------------------------------------------------------
# Kernel 1: bias-free linear layer  y = (x @ W).astype(out_dtype)
# Tiled over rows; the weight stays resident across the grid.  Output is bf16
# so the downstream gather / mailbox stream moves half the bytes.
# ---------------------------------------------------------------------------
def _linear_kernel(x_ref, w_ref, o_ref):
    o_ref[...] = jnp.dot(x_ref[...], w_ref[...],
                         preferred_element_type=jnp.float32).astype(o_ref.dtype)


def linear(x, w, *, out_dtype=jnp.bfloat16, tile_n=256):
    n, h = x.shape
    ho = w.shape[1]
    tn = min(tile_n, _round_up(n, 8))
    n_pad = _round_up(n, tn)
    xp = _pad_to(x, (n_pad, h))
    out = pl.pallas_call(
        _linear_kernel,
        out_shape=jax.ShapeDtypeStruct((n_pad, ho), out_dtype),
        grid=(n_pad // tn,),
        in_specs=[pl.BlockSpec((tn, h), lambda i: (i, 0)),
                  pl.BlockSpec((h, ho), lambda i: (0, 0))],
        out_specs=pl.BlockSpec((tn, ho), lambda i: (i, 0)),
        compiler_params=pltpu.CompilerParams(
            dimension_semantics=("parallel",),
            vmem_limit_bytes=_VMEM_LIMIT),
    )(xp, w)
    return out[:n]


# ---------------------------------------------------------------------------
# Kernel 2: DSGR attention reduce + gate + node update
#   (user_reduce / recipe_reduce followed by user_update / recipe_update)
# Inputs per node-tile:
#   time  [TN, Mp]  f32   edge times (-1e30 in padded mailbox columns)
#   mail  [TN, Mp, Hp] bf16  pre-gathered projected neighbor features
#   selfh [TN, Hp]  bf16  projected dst features (rows of uh / ih)
#   orig  [TN, Hp]  f32   raw dst features (residual path of the update)
# Resident (constant index_map) weights: de_t, dek, agg (split), upd (split).
# ---------------------------------------------------------------------------
def _attn_reduce_kernel(time_ref, mail_ref, selfh_ref, orig_ref,
                        det_ref, dek_ref, aggwa_ref, aggwb_ref,
                        updwa_ref, updwb_ref, o_ref, *, inv_sqrt_h, m_valid):
    neg = jnp.float32(_NEG)
    t = time_ref[...]                                   # [TN, Mp]
    nbr = mail_ref[...].astype(jnp.float32)             # [TN, Mp, Hp] (f32 VPU math)
    selfh = selfh_ref[...].astype(jnp.float32)          # [TN, Hp]
    orig = orig_ref[...]                                # [TN, Hp]
    tn, mp = t.shape

    m_iota = lax.broadcasted_iota(jnp.int32, (tn, mp), 1)
    valid = m_iota < m_valid                            # mask of real mailbox columns

    # ---- stable descending time rank (== M - argsort(argsort(t)) - 1) -------
    # Padded columns carry t = -1e30 < all real times, so the rank of real
    # columns is unchanged by the padding.
    cj = lax.broadcasted_iota(jnp.int32, (mp, mp), 1)
    ci = lax.broadcasted_iota(jnp.int32, (mp, mp), 0)
    tie = cj < ci
    before = jnp.logical_or(
        t[:, None, :] < t[:, :, None],
        jnp.logical_and(t[:, None, :] == t[:, :, None], tie[None, :, :]))
    # TODO(synk): if a bundle dump shows the XLU saturating, move this
    #             cross-lane sum (and the e / e1 reduces below) onto the MXU.
    rank_asc = jnp.sum(before.astype(jnp.int32), axis=2)            # [TN, Mp]
    reorder = (mp - 1) - rank_asc                                    # valid cols in [0, M)

    k_iota = lax.broadcasted_iota(jnp.int32, (1, 1, mp), 2)
    onehot_r = (reorder[:, :, None] == k_iota).astype(jnp.float32)  # [TN, Mp, Mp]

    # ---- long-term attention -------------------------------------------------
    # de_tab gather folded into the score:  e[n,k] += <selfh[n], de_tab[reorder[n,k]]>
    de_dot = jnp.dot(selfh, det_ref[...], preferred_element_type=jnp.float32)
    e = (jnp.sum(nbr * selfh[:, None, :], axis=2)
         + jnp.sum(onehot_r * de_dot[:, None, :], axis=2)) * inv_sqrt_h
    e = jnp.where(valid, e, neg)                       # mask padded mailbox cols
    e = e - jnp.max(e, axis=1, keepdims=True)
    p = jnp.exp(e)
    # NOTE: approx=True uses the EUP vrcp (idle slot); switch to exact division
    #       if bit-level parity with the PyTorch softmax is required.
    alpha = p * pl.reciprocal(jnp.sum(p, axis=1, keepdims=True), approx=True)
    # dek_tab gather folded into the alpha-weighted sum (padded ranks get weight 0)
    w_rank = jnp.sum(alpha[:, :, None] * onehot_r, axis=1)           # [TN, Mp]
    h_long = (jnp.sum(alpha[:, :, None] * nbr, axis=1)
              + jnp.dot(w_rank, dek_ref[...], preferred_element_type=jnp.float32))

    # ---- short-term attention (anchored at most-recent neighbor) ------------
    mx = jnp.max(jnp.where(valid, t, neg), axis=1, keepdims=True)
    hit = jnp.logical_and(valid, t == mx)
    last_idx = jnp.min(jnp.where(hit, m_iota, mp), axis=1, keepdims=True)
    onehot_last = (m_iota == last_idx).astype(jnp.float32)           # [TN, Mp]
    last_emb = jnp.sum(onehot_last[:, :, None] * nbr, axis=1)        # [TN, Hp]
    e1 = jnp.sum(last_emb[:, None, :] * nbr, axis=2) * inv_sqrt_h
    e1 = jnp.where(valid, e1, neg)
    e1 = e1 - jnp.max(e1, axis=1, keepdims=True)
    p1 = jnp.exp(e1)
    alpha1 = p1 * pl.reciprocal(jnp.sum(p1, axis=1, keepdims=True), approx=True)
    h_short = jnp.sum(alpha1[:, :, None] * nbr, axis=1)              # [TN, Hp]

    # ---- gate + update (split-K weights; ideal on v5e's 4x128^2 MXU) --------
    # TODO(synk): on v6e/v7x a single K=256 concat matmul fills the 256-deep
    #             MXU better (a few % on the matmul tail).
    agg = (jnp.dot(h_long, aggwa_ref[...], preferred_element_type=jnp.float32)
           + jnp.dot(h_short, aggwb_ref[...], preferred_element_type=jnp.float32))
    o_ref[...] = jnp.tanh(
        jnp.dot(agg, updwa_ref[...], preferred_element_type=jnp.float32)
        + jnp.dot(orig, updwb_ref[...], preferred_element_type=jnp.float32))


def attn_reduce(time, mail, selfh, orig, de_t, dek,
                aggwa, aggwb, updwa, updwb, *, hidden, m_valid, tile_n=128):
    n, mp = time.shape
    hp = orig.shape[1]
    tn = min(tile_n, _round_up(n, 8))     # sweep up to 256 on v5e/v6e; 128 on v7x
    n_pad = _round_up(n, tn)
    if (n_pad // tn) % 2 == 1:            # even tile count -> balanced v7x megacore
        n_pad += tn
    time = jnp.pad(time, ((0, n_pad - n), (0, 0)), constant_values=_NEG)
    mail = _pad_to(mail, (n_pad, mp, hp))
    selfh = _pad_to(selfh, (n_pad, hp))
    orig = _pad_to(orig, (n_pad, hp))

    kern = functools.partial(_attn_reduce_kernel,
                             inv_sqrt_h=1.0 / float(np.sqrt(hidden)),
                             m_valid=m_valid)
    res = lambda i: (0, 0)                # resident weight blocks
    out = pl.pallas_call(
        kern,
        out_shape=jax.ShapeDtypeStruct((n_pad, hp), jnp.float32),
        grid=(n_pad // tn,),
        in_specs=[pl.BlockSpec((tn, mp), lambda i: (i, 0)),        # edge times
                  pl.BlockSpec((tn, mp, hp), lambda i: (i, 0, 0)), # mailbox (bf16)
                  pl.BlockSpec((tn, hp), lambda i: (i, 0)),        # projected dst (bf16)
                  pl.BlockSpec((tn, hp), lambda i: (i, 0)),        # raw dst features
                  pl.BlockSpec((hp, mp), res),                     # de_tab^T
                  pl.BlockSpec((mp, hp), res),                     # dek_tab
                  pl.BlockSpec((hp, hp), res),                     # agg gate (long)
                  pl.BlockSpec((hp, hp), res),                     # agg gate (short)
                  pl.BlockSpec((hp, hp), res),                     # update (agg half)
                  pl.BlockSpec((hp, hp), res)],                    # update (orig half)
        out_specs=pl.BlockSpec((tn, hp), lambda i: (i, 0)),
        compiler_params=pltpu.CompilerParams(
            dimension_semantics=("parallel",),
            vmem_limit_bytes=_VMEM_LIMIT),
    )(time, mail, selfh, orig, de_t, dek, aggwa, aggwb, updwa, updwb)
    return out[:n]


# ---------------------------------------------------------------------------
# Host-side parameter preparation: split concat weights, pad H to 128 lanes,
# pad the positional tables to the padded mailbox width.  Zero-padding keeps
# the first-H lanes bit-faithful (inv_sqrt_h uses the ORIGINAL hidden size).
# ---------------------------------------------------------------------------
def prepare_params(params, hidden, m_u, mp_u, m_i, mp_i):
    hp = _round_up(hidden, 128)

    def pw(w):                                 # [hidden, hidden] -> [hp, hp]
        return _pad_to(w.astype(jnp.float32), (hp, hp))

    def split_pad(w):                          # [2*hidden, hidden] -> 2x [hp, hp]
        return pw(w[:hidden]), pw(w[hidden:])

    agg_u_a, agg_u_b = split_pad(params["agg_gate_user"])
    agg_r_a, agg_r_b = split_pad(params["agg_gate_recipe"])
    upd_u_a, upd_u_b = split_pad(params["user_update"])
    upd_r_a, upd_r_b = split_pad(params["recipe_update"])

    prep = {
        "user_w": pw(params["user_weight"]),
        "recipe_w": pw(params["recipe_weight"]),
        "agg_u_a": agg_u_a, "agg_u_b": agg_u_b,
        "agg_r_a": agg_r_a, "agg_r_b": agg_r_b,
        "upd_u_a": upd_u_a, "upd_u_b": upd_u_b,
        "upd_r_a": upd_r_a, "upd_r_b": upd_r_b,
        # positional (date) embedding tables, sliced to the real mailbox size
        # and zero-padded to the padded mailbox width (padded ranks never used).
        "u_de_t": _pad_to(params["user_date_emb"][:m_u].astype(jnp.float32).T, (hp, mp_u)),
        "u_dek":  _pad_to(params["user_date_emb_k"][:m_u].astype(jnp.float32), (mp_u, hp)),
        "r_de_t": _pad_to(params["recipe_date_emb"][:m_i].astype(jnp.float32).T, (hp, mp_i)),
        "r_dek":  _pad_to(params["recipe_date_emb_k"][:m_i].astype(jnp.float32), (mp_i, hp)),
    }
    return prep, hp


# ---------------------------------------------------------------------------
# DSGR forward pass (dense-mailbox formulation of graph.multi_update_all)
# ---------------------------------------------------------------------------
def dsgr_forward(params, user, item, u_nbr_idx, u_nbr_time,
                 i_nbr_idx, i_nbr_time, tile_n=128):
    hidden = user.shape[1]
    m_u = u_nbr_idx.shape[1]
    m_i = i_nbr_idx.shape[1]
    mp_u = _round_up(m_u, 16)                 # 50 -> 64: sublane/bf16-packed mailbox
    mp_i = _round_up(m_i, 16)
    prep, hp = prepare_params(params, hidden, m_u, mp_u, m_i, mp_i)

    user_p = _pad_to(user.astype(jnp.float32), (user.shape[0], hp))
    item_p = _pad_to(item.astype(jnp.float32), (item.shape[0], hp))

    # projected source-feature tables (bf16: half the gather + mailbox traffic)
    uh = linear(user_p, prep["user_w"])       # [NU, hp] bf16
    ih = linear(item_p, prep["recipe_w"])     # [NI, hp] bf16

    # True O(N*M*H) gathers — replaces the in-kernel one-hot matmul whose FLOPs
    # and VMEM scaled with the table size NT.  Indices are clamped so padded /
    # invalid ids read a valid row (their columns are masked inside the kernel).
    u_idx = jnp.clip(u_nbr_idx, 0, ih.shape[0] - 1).astype(jnp.int32)
    i_idx = jnp.clip(i_nbr_idx, 0, uh.shape[0] - 1).astype(jnp.int32)
    u_mail = _pad_to(jnp.take(ih, u_idx, axis=0), (user.shape[0], mp_u, hp))
    i_mail = _pad_to(jnp.take(uh, i_idx, axis=0), (item.shape[0], mp_i, hp))

    u_time = jnp.pad(u_nbr_time.astype(jnp.float32),
                     ((0, 0), (0, mp_u - m_u)), constant_values=_NEG)
    i_time = jnp.pad(i_nbr_time.astype(jnp.float32),
                     ((0, 0), (0, mp_i - m_i)), constant_values=_NEG)

    user_out = attn_reduce(u_time, u_mail, uh, user_p,
                           prep["u_de_t"], prep["u_dek"],
                           prep["agg_u_a"], prep["agg_u_b"],
                           prep["upd_u_a"], prep["upd_u_b"],
                           hidden=hidden, m_valid=m_u, tile_n=tile_n)
    item_out = attn_reduce(i_time, i_mail, ih, item_p,
                           prep["r_de_t"], prep["r_dek"],
                           prep["agg_r_a"], prep["agg_r_b"],
                           prep["upd_r_a"], prep["upd_r_b"],
                           hidden=hidden, m_valid=m_i, tile_n=tile_n)
    return {"user": user_out[:, :hidden], "item": item_out[:, :hidden]}


# ---------------------------------------------------------------------------
# Pure-JAX reference (for correctness check).  uh/ih are rounded through bf16
# exactly like the kernel path so the comparison is apples-to-apples.
# ---------------------------------------------------------------------------
def _ref_reduce(time, nbr, selfh, orig, de_tab, dek_tab, aggw, updw, hidden):
    m = time.shape[1]
    rank_asc = jnp.argsort(jnp.argsort(time, axis=1), axis=1)
    reorder = m - rank_asc - 1
    de = de_tab[reorder]
    dek = dek_tab[reorder]
    e = jnp.sum((de + nbr) * selfh[:, None, :], -1) / jnp.sqrt(float(hidden))
    alpha = jax.nn.softmax(e, axis=1)
    h_long = jnp.sum(alpha[..., None] * (nbr + dek), axis=1)
    last = jnp.argmax(time, axis=1)
    last_emb = nbr[jnp.arange(nbr.shape[0]), last]
    e1 = jnp.sum(last_emb[:, None, :] * nbr, -1) / jnp.sqrt(float(hidden))
    alpha1 = jax.nn.softmax(e1, axis=1)
    h_short = jnp.sum(alpha1[..., None] * nbr, axis=1)
    agg = jnp.concatenate([h_long, h_short], -1) @ aggw
    return jnp.tanh(jnp.concatenate([agg, orig], -1) @ updw)


def _ref_forward(params, user, item, u_nbr_idx, u_nbr_time, i_nbr_idx, i_nbr_time):
    hidden = user.shape[1]
    m_u = u_nbr_idx.shape[1]
    m_i = i_nbr_idx.shape[1]
    uh = (user @ params["user_weight"]).astype(jnp.bfloat16).astype(jnp.float32)
    ih = (item @ params["recipe_weight"]).astype(jnp.bfloat16).astype(jnp.float32)
    u_mail = ih[u_nbr_idx]
    i_mail = uh[i_nbr_idx]
    user_out = _ref_reduce(u_nbr_time, u_mail, uh, user,
                           params["user_date_emb"][:m_u], params["user_date_emb_k"][:m_u],
                           params["agg_gate_user"], params["user_update"], hidden)
    item_out = _ref_reduce(i_nbr_time, i_mail, ih, item,
                           params["recipe_date_emb"][:m_i], params["recipe_date_emb_k"][:m_i],
                           params["agg_gate_recipe"], params["recipe_update"], hidden)
    return {"user": user_out, "item": item_out}


# ---------------------------------------------------------------------------
# Deterministic parameter init (matches module __init__ shapes; synthetic).
# Linear weights are stored pre-transposed as [in_features, out_features].
# ---------------------------------------------------------------------------
def init_params(key, hidden):
    ks = jax.random.split(key, 10)
    s = 0.1
    return {
        "agg_gate_user":   s * jax.random.normal(ks[0], (2 * hidden, hidden), jnp.float32),
        "agg_gate_recipe": s * jax.random.normal(ks[1], (2 * hidden, hidden), jnp.float32),
        "user_weight":     s * jax.random.normal(ks[2], (hidden, hidden), jnp.float32),
        "recipe_weight":   s * jax.random.normal(ks[3], (hidden, hidden), jnp.float32),
        "user_update":     s * jax.random.normal(ks[4], (2 * hidden, hidden), jnp.float32),
        "recipe_update":   s * jax.random.normal(ks[5], (2 * hidden, hidden), jnp.float32),
        "recipe_date_emb":   jax.random.normal(ks[6], (USER_MAX_LEN, hidden), jnp.float32),
        "recipe_date_emb_k": jax.random.normal(ks[7], (USER_MAX_LEN, hidden), jnp.float32),
        "user_date_emb":     jax.random.normal(ks[8], (ITEM_MAX_LEN, hidden), jnp.float32),
        "user_date_emb_k":   jax.random.normal(ks[9], (ITEM_MAX_LEN, hidden), jnp.float32),
    }


if __name__ == "__main__":
    HIDDEN = 32      # input_features
    NU, NI = 8, 8    # number of user / item nodes
    M = 8            # neighbors per node (dense mailbox size, <= 50)

    key = jax.random.PRNGKey(0)
    k_par, k_u, k_i, k_ui, k_ii, k_ut, k_it = jax.random.split(key, 7)

    params = init_params(k_par, HIDDEN)
    user = jax.random.normal(k_u, (NU, HIDDEN), jnp.float32)
    item = jax.random.normal(k_i, (NI, HIDDEN), jnp.float32)
    u_nbr_idx = jax.random.randint(k_ui, (NU, M), 0, NI)
    i_nbr_idx = jax.random.randint(k_ii, (NI, M), 0, NU)
    u_nbr_time = jax.random.uniform(k_ut, (NU, M), jnp.float32, 0.0, 100.0)
    i_nbr_time = jax.random.uniform(k_it, (NI, M), jnp.float32, 0.0, 100.0)

    fwd = jax.jit(dsgr_forward)
    out = fwd(params, user, item, u_nbr_idx, u_nbr_time, i_nbr_idx, i_nbr_time)
    jax.block_until_ready(out)

    ref = _ref_forward(params, user, item, u_nbr_idx, u_nbr_time,
                       i_nbr_idx, i_nbr_time)
    # tolerance covers the bf16 projected tables/mailbox (mirrored in the
    # reference), the EUP approximate reciprocal in both softmaxes and
    # MXU-vs-XLA f32 matmul rounding differences.
    np.testing.assert_allclose(np.asarray(out["user"]), np.asarray(ref["user"]),
                               rtol=5e-3, atol=5e-3)
    np.testing.assert_allclose(np.asarray(out["item"]), np.asarray(ref["item"]),
                               rtol=5e-3, atol=5e-3)
    print("KERNEL_OK")
</pallas_src>

<mosaic_0001>
module attributes {stable_mosaic.version = 11 : i64} {
  func.func @_linear_kernel(%arg0: i32, %arg1: memref<8x128xf32, #tpu.memory_space<vmem>>, %arg2: memref<128x128xf32, #tpu.memory_space<vmem>>, %arg3: memref<8x128xbf16, #tpu.memory_space<vmem>>) attributes {dimension_semantics = [#tpu.dimension_semantics<parallel>], iteration_bounds = array<i64: 1>, scalar_prefetch = 0 : i64, scratch_operands = 0 : i64, tpu.core_type = #tpu.core_type<tc>, window_params = [{transform_indices = @transform_0, window_bounds = array<i64: 8, 128>}, {pipeline_mode = #tpu.pipeline_mode<synchronous>, transform_indices = @transform_1, window_bounds = array<i64: 128, 128>}, {transform_indices = @transform_2, window_bounds = array<i64: 8, 128>}]} {
    %c0 = arith.constant 0 : index
    %c0_0 = arith.constant 0 : index
    %0 = vector.load %arg1[%c0, %c0_0] : memref<8x128xf32, #tpu.memory_space<vmem>>, vector<8x128xf32>
    %c0_1 = arith.constant 0 : index
    %c0_2 = arith.constant 0 : index
    %1 = vector.load %arg2[%c0_1, %c0_2] : memref<128x128xf32, #tpu.memory_space<vmem>>, vector<128x128xf32>
    %cst = arith.constant dense<0.000000e+00> : vector<8x128xf32>
    %2 = tpu.matmul %0, %1, %cst {dimension_numbers = #tpu.dot_dimension_numbers<[1], [0], [0], [1], [0, 0, 1, 1], [], []>} : vector<8x128xf32>, vector<128x128xf32>, vector<8x128xf32> -> vector<8x128xf32>
    %3 = arith.truncf %2 : vector<8x128xf32> to vector<8x128xbf16>
    %c0_3 = arith.constant 0 : index
    %c0_4 = arith.constant 0 : index
    %4 = vector.load %arg3[%c0_3, %c0_4] : memref<8x128xbf16, #tpu.memory_space<vmem>>, vector<8x128xbf16>
    tpu.vector_store %arg3[%c0_3, %c0_4], %3 {strides = array<i32>} : memref<8x128xbf16, #tpu.memory_space<vmem>>, vector<8x128xbf16>,
    return
  }
  func.func @transform_0(%arg0: i32) -> (i32, i32) {
    %c0_i32 = arith.constant 0 : i32
    %c0_i32_0 = arith.constant 0 : i32
    return %arg0, %c0_i32 : i32, i32
  }
  func.func @transform_1(%arg0: i32) -> (i32, i32) {
    %c0_i32 = arith.constant 0 : i32
    %c0_i32_0 = arith.constant 0 : i32
    %c0_i32_1 = arith.constant 0 : i32
    return %c0_i32, %c0_i32_0 : i32, i32
  }
  func.func @transform_2(%arg0: i32) -> (i32, i32) {
    %c0_i32 = arith.constant 0 : i32
    %c0_i32_0 = arith.constant 0 : i32
    return %arg0, %c0_i32 : i32, i32
  }
}

module attributes {stable_mosaic.version = 11 : i64} {
  func.func @_attn_reduce_kernel(%arg0: i32, %arg1: memref<8x16xf32, #tpu.memory_space<vmem>>, %arg2: memref<8x16x128xbf16, #tpu.memory_space<vmem>>, %arg3: memref<8x128xbf16, #tpu.memory_space<vmem>>, %arg4: memref<8x128xf32, #tpu.memory_space<vmem>>, %arg5: memref<128x16xf32, #tpu.memory_space<vmem>>, %arg6: memref<16x128xf32, #tpu.memory_space<vmem>>, %arg7: memref<128x128xf32, #tpu.memory_space<vmem>>, %arg8: memref<128x128xf32, #tpu.memory_space<vmem>>, %arg9: memref<128x128xf32, #tpu.memory_space<vmem>>, %arg10: memref<128x128xf32, #tpu.memory_space<vmem>>, %arg11: memref<8x128xf32, #tpu.memory_space<vmem>>) attributes {dimension_semantics = [#tpu.dimension_semantics<parallel>], iteration_bounds = array<i64: 2>, scalar_prefetch = 0 : i64, scratch_operands = 0 : i64, tpu.core_type = #tpu.core_type<tc>, window_params = [{transform_indices = @transform_0, window_bounds = array<i64: 8, 16>}, {transform_indices = @transform_1, window_bounds = array<i64: 8, 16, 128>}, {transform_indices = @transform_2, window_bounds = array<i64: 8, 128>}, {transform_indices = @transform_3, window_bounds = array<i64: 8, 128>}, {pipeline_mode = #tpu.pipeline_mode<synchronous>, transform_indices = @transform_4, window_bounds = array<i64: 128, 16>}, {pipeline_mode = #tpu.pipeline_mode<synchronous>, transform_indices = @transform_5, window_bounds = array<i64: 16, 128>}, {pipeline_mode = #tpu.pipeline_mode<synchronous>, transform_indices = @transform_6, window_bounds = array<i64: 128, 128>}, {pipeline_mode = #tpu.pipeline_mode<synchronous>, transform_indices = @transform_7, window_bounds = array<i64: 128, 128>}, {pipeline_mode = #tpu.pipeline_mode<synchronous>, transform_indices = @transform_8, window_bounds = array<i64: 128, 128>}, {pipeline_mode = #tpu.pipeline_mode<synchronous>, transform_indices = @transform_9, window_bounds = array<i64: 128, 128>}, {transform_indices = @transform_10, window_bounds = array<i64: 8, 128>}]} {
    %c0 = arith.constant 0 : index
    %c0_0 = arith.constant 0 : index
    %0 = vector.load %arg1[%c0, %c0_0] : memref<8x16xf32, #tpu.memory_space<vmem>>, vector<8x16xf32>
    %c0_1 = arith.constant 0 : index
    %c0_2 = arith.constant 0 : index
    %c0_3 = arith.constant 0 : index
    %1 = vector.load %arg2[%c0_1, %c0_2, %c0_3] : memref<8x16x128xbf16, #tpu.memory_space<vmem>>, vector<8x16x128xbf16>
    %2 = arith.extf %1 : vector<8x16x128xbf16> to vector<8x16x128xf32>
    %c0_4 = arith.constant 0 : index
    %c0_5 = arith.constant 0 : index
    %3 = vector.load %arg3[%c0_4, %c0_5] : memref<8x128xbf16, #tpu.memory_space<vmem>>, vector<8x128xbf16>
    %4 = arith.extf %3 : vector<8x128xbf16> to vector<8x128xf32>
    %c0_6 = arith.constant 0 : index
    %c0_7 = arith.constant 0 : index
    %5 = vector.load %arg4[%c0_6, %c0_7] : memref<8x128xf32, #tpu.memory_space<vmem>>, vector<8x128xf32>
    %6 = tpu.iota {dimensions = array<i32: 1>} : vector<8x16xi32>
    %c8_i32 = arith.constant 8 : i32
    %7 = vector.broadcast %c8_i32 : i32 to vector<8x16xi32>
    %8 = arith.cmpi slt, %6, %7 : vector<8x16xi32>
    %9 = tpu.iota {dimensions = array<i32: 1>} : vector<16x16xi32>
    %10 = tpu.iota {dimensions = array<i32: 0>} : vector<16x16xi32>
    %11 = arith.cmpi slt, %9, %10 : vector<16x16xi32>
    %12 = vector.shape_cast %0 : vector<8x16xf32> to vector<8x1x16xf32>
    %13 = vector.shape_cast %0 : vector<8x16xf32> to vector<8x16x1xf32>
    %14 = vector.broadcast %12 : vector<8x1x16xf32> to vector<8x16x16xf32>
    %15 = vector.broadcast %13 : vector<8x16x1xf32> to vector<8x16x16xf32>
    %16 = arith.cmpf olt, %14, %15 : vector<8x16x16xf32>
    %17 = vector.shape_cast %0 : vector<8x16xf32> to vector<8x1x16xf32>
    %18 = vector.shape_cast %0 : vector<8x16xf32> to vector<8x16x1xf32>
    %19 = vector.broadcast %17 : vector<8x1x16xf32> to vector<8x16x16xf32>
    %20 = vector.broadcast %18 : vector<8x16x1xf32> to vector<8x16x16xf32>
    %21 = arith.cmpf oeq, %19, %20 : vector<8x16x16xf32>
    %22 = vector.shape_cast %11 : vector<16x16xi1> to vector<1x16x16xi1>
    %23 = vector.broadcast %22 : vector<1x16x16xi1> to vector<8x16x16xi1>
    %24 = arith.andi %21, %23 : vector<8x16x16xi1>
    %25 = arith.ori %16, %24 : vector<8x16x16xi1>
    %26 = arith.extui %25 : vector<8x16x16xi1> to vector<8x16x16xi32>
    %cst = arith.constant dense<0> : vector<8x16xi32>
    %27 = vector.multi_reduction <add>, %26, %cst [2] : vector<8x16x16xi32> to vector<8x16xi32>
    %c15_i32 = arith.constant 15 : i32
    %28 = vector.broadcast %c15_i32 : i32 to vector<8x16xi32>
    %29 = arith.subi %28, %27 : vector<8x16xi32>
    %30 = tpu.iota {dimensions = array<i32: 2>} : vector<1x1x16xi32>
    %31 = vector.shape_cast %29 : vector<8x16xi32> to vector<8x16x1xi32>
    %32 = vector.broadcast %31 : vector<8x16x1xi32> to vector<8x16x16xi32>
    %33 = vector.broadcast %30 : vector<1x1x16xi32> to vector<8x16x16xi32>
    %34 = arith.cmpi eq, %32, %33 : vector<8x16x16xi32>
    %35 = arith.extui %34 : vector<8x16x16xi1> to vector<8x16x16xi32>
    %36 = arith.sitofp %35 : vector<8x16x16xi32> to vector<8x16x16xf32>
    %c0_8 = arith.constant 0 : index
    %c0_9 = arith.constant 0 : index
    %37 = vector.load %arg5[%c0_8, %c0_9] : memref<128x16xf32, #tpu.memory_space<vmem>>, vector<128x16xf32>
    %cst_10 = arith.constant dense<0.000000e+00> : vector<8x16xf32>
    %38 = tpu.matmul %4, %37, %cst_10 {dimension_numbers = #tpu.dot_dimension_numbers<[1], [0], [0], [1], [0, 0, 1, 1], [], []>} : vector<8x128xf32>, vector<128x16xf32>, vector<8x16xf32> -> vector<8x16xf32>
    %39 = vector.shape_cast %4 : vector<8x128xf32> to vector<8x1x128xf32>
    %40 = vector.broadcast %39 : vector<8x1x128xf32> to vector<8x16x128xf32>
    %41 = arith.mulf %2, %40 : vector<8x16x128xf32>
    %cst_11 = arith.constant dense<0.000000e+00> : vector<8x16xf32>
    %42 = vector.multi_reduction <add>, %41, %cst_11 [2] : vector<8x16x128xf32> to vector<8x16xf32>
    %43 = vector.shape_cast %38 : vector<8x16xf32> to vector<8x1x16xf32>
    %44 = vector.broadcast %43 : vector<8x1x16xf32> to vector<8x16x16xf32>
    %45 = arith.mulf %36, %44 : vector<8x16x16xf32>
    %cst_12 = arith.constant dense<0.000000e+00> : vector<8x16xf32>
    %46 = vector.multi_reduction <add>, %45, %cst_12 [2] : vector<8x16x16xf32> to vector<8x16xf32>
    %47 = arith.addf %42, %46 : vector<8x16xf32>
    %cst_13 = arith.constant 0.176776692 : f32
    %48 = vector.broadcast %cst_13 : f32 to vector<8x16xf32>
    %49 = arith.mulf %47, %48 : vector<8x16xf32>
    %cst_14 = arith.constant -1.000000e+30 : f32
    %50 = vector.broadcast %cst_14 : f32 to vector<8x16xf32>
    %51 = arith.select %8, %49, %50 : vector<8x16xi1>, vector<8x16xf32>
    %cst_15 = arith.constant dense<0xFF800000> : vector<8xf32>
    %52 = vector.multi_reduction <maximumf>, %51, %cst_15 [1] : vector<8x16xf32> to vector<8xf32>
    %53 = vector.shape_cast %52 : vector<8xf32> to vector<8x1xf32>
    %54 = vector.broadcast %53 : vector<8x1xf32> to vector<8x16xf32>
    %55 = arith.subf %51, %54 : vector<8x16xf32>
    %56 = math.exp %55 : vector<8x16xf32>
    %cst_16 = arith.constant dense<0.000000e+00> : vector<8xf32>
    %57 = vector.multi_reduction <add>, %56, %cst_16 [1] : vector<8x16xf32> to vector<8xf32>
    %58 = vector.shape_cast %57 : vector<8xf32> to vector<8x1xf32>
    %59 = tpu.reciprocal %58 {approx = true} : vector<8x1xf32> -> vector<8x1xf32>
    %60 = vector.broadcast %59 : vector<8x1xf32> to vector<8x16xf32>
    %61 = arith.mulf %56, %60 : vector<8x16xf32>
    %62 = vector.shape_cast %61 : vector<8x16xf32> to vector<8x16x1xf32>
    %63 = vector.broadcast %62 : vector<8x16x1xf32> to vector<8x16x16xf32>
    %64 = arith.mulf %63, %36 : vector<8x16x16xf32>
    %cst_17 = arith.constant dense<0.000000e+00> : vector<8x16xf32>
    %65 = vector.multi_reduction <add>, %64, %cst_17 [1] : vector<8x16x16xf32> to vector<8x16xf32>
    %66 = vector.shape_cast %61 : vector<8x16xf32> to vector<8x16x1xf32>
    %67 = vector.broadcast %66 : vector<8x16x1xf32> to vector<8x16x128xf32>
    %68 = arith.mulf %67, %2 : vector<8x16x128xf32>
    %cst_18 = arith.constant dense<0.000000e+00> : vector<8x128xf32>
    %69 = vector.multi_reduction <add>, %68, %cst_18 [1] : vector<8x16x128xf32> to vector<8x128xf32>
    %c0_19 = arith.constant 0 : index
    %c0_20 = arith.constant 0 : index
    %70 = vector.load %arg6[%c0_19, %c0_20] : memref<16x128xf32, #tpu.memory_space<vmem>>, vector<16x128xf32>
    %cst_21 = arith.constant dense<0.000000e+00> : vector<8x128xf32>
    %71 = tpu.matmul %65, %70, %cst_21 {dimension_numbers = #tpu.dot_dimension_numbers<[1], [0], [0], [1], [0, 0, 1, 1], [], []>} : vector<8x16xf32>, vector<16x128xf32>, vector<8x128xf32> -> vector<8x128xf32>
    %72 = arith.addf %69, %71 : vector<8x128xf32>
    %cst_22 = arith.constant -1.000000e+30 : f32
    %73 = vector.broadcast %cst_22 : f32 to vector<8x16xf32>
    %74 = arith.select %8, %0, %73 : vector<8x16xi1>, vector<8x16xf32>
    %cst_23 = arith.constant dense<0xFF800000> : vector<8xf32>
    %75 = vector.multi_reduction <maximumf>, %74, %cst_23 [1] : vector<8x16xf32> to vector<8xf32>
    %76 = vector.shape_cast %75 : vector<8xf32> to vector<8x1xf32>
    %77 = vector.broadcast %76 : vector<8x1xf32> to vector<8x16xf32>
    %78 = arith.cmpf oeq, %0, %77 : vector<8x16xf32>
    %79 = arith.andi %8, %78 : vector<8x16xi1>
    %c16_i32 = arith.constant 16 : i32
    %80 = vector.broadcast %c16_i32 : i32 to vector<8x16xi32>
    %81 = arith.select %79, %6, %80 : vector<8x16xi1>, vector<8x16xi32>
    %cst_24 = arith.constant dense<2147483647> : vector<8xi32>
    %82 = vector.multi_reduction <minsi>, %81, %cst_24 [1] : vector<8x16xi32> to vector<8xi32>
    %83 = vector.shape_cast %82 : vector<8xi32> to vector<8x1xi32>
    %84 = vector.broadcast %83 : vector<8x1xi32> to vector<8x16xi32>
    %85 = arith.cmpi eq, %6, %84 : vector<8x16xi32>
    %86 = arith.extui %85 : vector<8x16xi1> to vector<8x16xi32>
    %87 = arith.sitofp %86 : vector<8x16xi32> to vector<8x16xf32>
    %88 = vector.shape_cast %87 : vector<8x16xf32> to vector<8x16x1xf32>
    %89 = vector.broadcast %88 : vector<8x16x1xf32> to vector<8x16x128xf32>
    %90 = arith.mulf %89, %2 : vector<8x16x128xf32>
    %cst_25 = arith.constant dense<0.000000e+00> : vector<8x128xf32>
    %91 = vector.multi_reduction <add>, %90, %cst_25 [1] : vector<8x16x128xf32> to vector<8x128xf32>
    %92 = vector.shape_cast %91 : vector<8x128xf32> to vector<8x1x128xf32>
    %93 = vector.broadcast %92 : vector<8x1x128xf32> to vector<8x16x128xf32>
    %94 = arith.mulf %93, %2 : vector<8x16x128xf32>
    %cst_26 = arith.constant dense<0.000000e+00> : vector<8x16xf32>
    %95 = vector.multi_reduction <add>, %94, %cst_26 [2] : vector<8x16x128xf32> to vector<8x16xf32>
    %cst_27 = arith.constant 0.176776692 : f32
    %96 = vector.broadcast %cst_27 : f32 to vector<8x16xf32>
    %97 = arith.mulf %95, %96 : vector<8x16xf32>
    %cst_28 = arith.constant -1.000000e+30 : f32
    %98 = vector.broadcast %cst_28 : f32 to vector<8x16xf32>
    %99 = arith.select %8, %97, %98 : vector<8x16xi1>, vector<8x16xf32>
    %cst_29 = arith.constant dense<0xFF800000> : vector<8xf32>
    %100 = vector.multi_reduction <maximumf>, %99, %cst_29 [1] : vector<8x16xf32> to vector<8xf32>
    %101 = vector.shape_cast %100 : vector<8xf32> to vector<8x1xf32>
    %102 = vector.broadcast %101 : vector<8x1xf32> to vector<8x16xf32>
    %103 = arith.subf %99, %102 : vector<8x16xf32>
    %104 = math.exp %103 : vector<8x16xf32>
    %cst_30 = arith.constant dense<0.000000e+00> : vector<8xf32>
    %105 = vector.multi_reduction <add>, %104, %cst_30 [1] : vector<8x16xf32> to vector<8xf32>
    %106 = vector.shape_cast %105 : vector<8xf32> to vector<8x1xf32>
    %107 = tpu.reciprocal %106 {approx = true} : vector<8x1xf32> -> vector<8x1xf32>
    %108 = vector.broadcast %107 : vector<8x1xf32> to vector<8x16xf32>
    %109 = arith.mulf %104, %108 : vector<8x16xf32>
    %110 = vector.shape_cast %109 : vector<8x16xf32> to vector<8x16x1xf32>
    %111 = vector.broadcast %110 : vector<8x16x1xf32> to vector<8x16x128xf32>
    %112 = arith.mulf %111, %2 : vector<8x16x128xf32>
    %cst_31 = arith.constant dense<0.000000e+00> : vector<8x128xf32>
    %113 = vector.multi_reduction <add>, %112, %cst_31 [1] : vector<8x16x128xf32> to vector<8x128xf32>
    %c0_32 = arith.constant 0 : index
    %c0_33 = arith.constant 0 : index
    %114 = vector.load %arg7[%c0_32, %c0_33] : memref<128x128xf32, #tpu.memory_space<vmem>>, vector<128x128xf32>
    %cst_34 = arith.constant dense<0.000000e+00> : vector<8x128xf32>
    %115 = tpu.matmul %72, %114, %cst_34 {dimension_numbers = #tpu.dot_dimension_numbers<[1], [0], [0], [1], [0, 0, 1, 1], [], []>} : vector<8x128xf32>, vector<128x128xf32>, vector<8x128xf32> -> vector<8x128xf32>
    %c0_35 = arith.constant 0 : index
    %c0_36 = arith.constant 0 : index
    %116 = vector.load %arg8[%c0_35, %c0_36] : memref<128x128xf32, #tpu.memory_space<vmem>>, vector<128x128xf32>
    %cst_37 = arith.constant dense<0.000000e+00> : vector<8x128xf32>
    %117 = tpu.matmul %113, %116, %cst_37 {dimension_numbers = #tpu.dot_dimension_numbers<[1], [0], [0], [1], [0, 0, 1, 1], [], []>} : vector<8x128xf32>, vector<128x128xf32>, vector<8x128xf32> -> vector<8x128xf32>
    %118 = arith.addf %115, %117 : vector<8x128xf32>
    %c0_38 = arith.constant 0 : index
    %c0_39 = arith.constant 0 : index
    %119 = vector.load %arg9[%c0_38, %c0_39] : memref<128x128xf32, #tpu.memory_space<vmem>>, vector<128x128xf32>
    %cst_40 = arith.constant dense<0.000000e+00> : vector<8x128xf32>
    %120 = tpu.matmul %118, %119, %cst_40 {dimension_numbers = #tpu.dot_dimension_numbers<[1], [0], [0], [1], [0, 0, 1, 1], [], []>} : vector<8x128xf32>, vector<128x128xf32>, vector<8x128xf32> -> vector<8x128xf32>
    %c0_41 = arith.constant 0 : index
    %c0_42 = arith.constant 0 : index
    %121 = vector.load %arg10[%c0_41, %c0_42] : memref<128x128xf32, #tpu.memory_space<vmem>>, vector<128x128xf32>
    %cst_43 = arith.constant dense<0.000000e+00> : vector<8x128xf32>
    %122 = tpu.matmul %5, %121, %cst_43 {dimension_numbers = #tpu.dot_dimension_numbers<[1], [0], [0], [1], [0, 0, 1, 1], [], []>} : vector<8x128xf32>, vector<128x128xf32>, vector<8x128xf32> -> vector<8x128xf32>
    %123 = arith.addf %120, %122 : vector<8x128xf32>
    %124 = math.tanh %123 : vector<8x128xf32>
    %c0_44 = arith.constant 0 : index
    %c0_45 = arith.constant 0 : index
    %125 = vector.load %arg11[%c0_44, %c0_45] : memref<8x128xf32, #tpu.memory_space<vmem>>, vector<8x128xf32>
    tpu.vector_store %arg11[%c0_44, %c0_45], %124 {strides = array<i32>} : memref<8x128xf32, #tpu.memory_space<vmem>>, vector<8x128xf32>,
    return
  }
  func.func @transform_0(%arg0: i32) -> (i32, i32) {
    %c0_i32 = arith.constant 0 : i32
    %c0_i32_0 = arith.constant 0 : i32
    return %arg0, %c0_i32 : i32, i32
  }
  func.func @transform_1(%arg0: i32) -> (i32, i32, i32) {
    %c0_i32 = arith.constant 0 : i32
    %c0_i32_0 = arith.constant 0 : i32
    %c0_i32_1 = arith.constant 0 : i32
    return %arg0, %c0_i32, %c0_i32_0 : i32, i32, i32
  }
  func.func @transform_2(%arg0: i32) -> (i32, i32) {
    %c0_i32 = arith.constant 0 : i32
    %c0_i32_0 = arith.constant 0 : i32
    return %arg0, %c0_i32 : i32, i32
  }
  func.func @transform_3(%arg0: i32) -> (i32, i32) {
    %c0_i32 = arith.constant 0 : i32
    %c0_i32_0 = arith.constant 0 : i32
    return %arg0, %c0_i32 : i32, i32
  }
  func.func @transform_4(%arg0: i32) -> (i32, i32) {
    %c0_i32 = arith.constant 0 : i32
    %c0_i32_0 = arith.constant 0 : i32
    %c0_i32_1 = arith.constant 0 : i32
    return %c0_i32, %c0_i32_0 : i32, i32
  }
  func.func @transform_5(%arg0: i32) -> (i32, i32) {
    %c0_i32 = arith.constant 0 : i32
    %c0_i32_0 = arith.constant 0 : i32
    %c0_i32_1 = arith.constant 0 : i32
    return %c0_i32, %c0_i32_0 : i32, i32
  }
  func.func @transform_6(%arg0: i32) -> (i32, i32) {
    %c0_i32 = arith.constant 0 : i32
    %c0_i32_0 = arith.constant 0 : i32
    %c0_i32_1 = arith.constant 0 : i32
    return %c0_i32, %c0_i32_0 : i32, i32
  }
  func.func @transform_7(%arg0: i32) -> (i32, i32) {
    %c0_i32 = arith.constant 0 : i32
    %c0_i32_0 = arith.constant 0 : i32
    %c0_i32_1 = arith.constant 0 : i32
    return %c0_i32, %c0_i32_0 : i32, i32
  }
  func.func @transform_8(%arg0: i32) -> (i32, i32) {
    %c0_i32 = arith.constant 0 : i32
    %c0_i32_0 = arith.constant 0 : i32
    %c0_i32_1 = arith.constant 0 : i32
    return %c0_i32, %c0_i32_0 : i32, i32
  }
  func.func @transform_9(%arg0: i32) -> (i32, i32) {
    %c0_i32 = arith.constant 0 : i32
    %c0_i32_0 = arith.constant 0 : i32
    %c0_i32_1 = arith.constant 0 : i32
    return %c0_i32, %c0_i32_0 : i32, i32
  }
  func.func @transform_10(%arg0: i32) -> (i32, i32) {
    %c0_i32 = arith.constant 0 : i32
    %c0_i32_0 = arith.constant 0 : i32
    return %arg0, %c0_i32 : i32, i32
  }
}

</mosaic_0001>

<bundles_post_ra>
// kernel: dsgr_forward.5
= control target key start
LH: loop header
LB: loop body
LE: loop exit
PB: predicated region body
PF: predicated region fallthrough
CT: control target
= control target key end

     0   :  { %v183_v0 = vmov 0.0|0.0   ;;  %vm184_vm0 = vmmov 0   ;;  %v185_v4 = vmov 0.0   ;;  %s255_s1 = inlined_call_operand.vmem [shape: f32[128,128], index: 1, kind: input, shape index: {}]   ;;  %s256_s0 = inlined_call_operand.vmem [shape: f32[8,128], index: 0, kind: input, shape index: {}]   ;;  %s257_s2 = inlined_call_operand.vmem [shape: bf16[8,128], index: 2, kind: output, shape index: {}]  }
   0x1   :  { %156 = vmatprep.subr.bf16.mxu0 %v183_v0  ;;  %v12_v1 = vld [vmem:[%s255_s1] sm:$0xff]  ;;  %v13_v2 = vld [vmem:[%s255_s1 + $0x8] sm:$0xff]  ;;  %v14_v3 = vld [vmem:[%s255_s1 + $0x10] sm:$0xff]  ;;  %153 = vmatprep.mubr.msk.f32.mxu0 %vm184_vm0, %v185_v4 }
   0x2   :  { %v157_v5 = vpack.c.bf16 %v13_v2, %v12_v1  ;;  %v15_v6 = vld [vmem:[%s255_s1 + $0x18] sm:$0xff]  ;;  %v16_v8 = vld [vmem:[%s255_s1 + $0x20] sm:$0xff]  ;;  %v17_v9 = vld [vmem:[%s255_s1 + $0x28] sm:$0xff] }
   0x3   :  { %v160_v7 = vpack.c.bf16 %v15_v6, %v14_v3  ;;  %v163_v10 = vpack.c.bf16 %v17_v9, %v16_v8  ;;  %v18_v11 = vld [vmem:[%s255_s1 + $0x30] sm:$0xff]  ;;  %v19_v12 = vld [vmem:[%s255_s1 + $0x38] sm:$0xff]  ;;  %v20_v14 = vld [vmem:[%s255_s1 + $0x40] sm:$0xff] }
   0x4   :  { %158 = vmatpush3.bf16.msra.mxu0 %v157_v5  ;;  %v166_v13 = vpack.c.bf16 %v19_v12, %v18_v11  ;;  %v21_v15 = vld [vmem:[%s255_s1 + $0x48] sm:$0xff]  ;;  %v22_v17 = vld [vmem:[%s255_s1 + $0x50] sm:$0xff]  ;;  %v23_v18 = vld [vmem:[%s255_s1 + $0x58] sm:$0xff] }
   0x5   :  { %159 = vmatprep.subr.bf16.mxu0 %v183_v0  ;;  %v169_v16 = vpack.c.bf16 %v21_v15, %v20_v14  ;;  %v172_v19 = vpack.c.bf16 %v23_v18, %v22_v17  ;;  %v24_v20 = vld [vmem:[%s255_s1 + $0x60] sm:$0xff]  ;;  %v25_v21 = vld [vmem:[%s255_s1 + $0x68] sm:$0xff]  ;;  %v26_v23 = vld [vmem:[%s255_s1 + $0x70] sm:$0xff] }
   0x6   :  { %v175_v22 = vpack.c.bf16 %v25_v21, %v24_v20  ;;  %v27_v24 = vld [vmem:[%s255_s1 + $0x78] sm:$0xff]  ;;  %v11_v26 = vld [vmem:[%s256_s0] sm:$0xff] }
   0x7   :  { %v178_v25 = vpack.c.bf16 %v27_v24, %v26_v23 }
   0x8   :  { %161 = vmatpush3.bf16.msra.mxu0 %v160_v7 }
   0x9   :  { %162 = vmatprep.subr.bf16.mxu0 %v183_v0 }
   0xc   :  { %164 = vmatpush3.bf16.msra.mxu0 %v163_v10 }
   0xd   :  { %165 = vmatprep.subr.bf16.mxu0 %v183_v0 }
  0x10   :  { %167 = vmatpush3.bf16.msra.mxu0 %v166_v13 }
  0x11   :  { %168 = vmatprep.subr.bf16.mxu0 %v183_v0 }
  0x14   :  { %170 = vmatpush3.bf16.msra.mxu0 %v169_v16 }
  0x15   :  { %171 = vmatprep.subr.bf16.mxu0 %v183_v0 }
  0x18   :  { %173 = vmatpush3.bf16.msra.mxu0 %v172_v19 }
  0x19   :  { %174 = vmatprep.subr.bf16.mxu0 %v183_v0 }
  0x1c   :  { %176 = vmatpush3.bf16.msra.mxu0 %v175_v22 }
  0x1d   :  { %177 = vmatprep.subr.bf16.mxu0 %v183_v0 }
  0x20   :  { %179 = vmatpush3.bf16.msra.mxu0 %v178_v25 }
  0x23   :  { %154 = vmatmul.mubr.f32.vlgmr.msra.gmra.mrb[0].mxu0 %v11_v26 }
  0xf6   :  { %v94_v27 = vpop.f32.mrb[0].mxu0 }
  0xf7   :  { %v98_v28 = vpack.c.bf16 %v94_v27, %v94_v27  ;;  %v155_v29 = vpop.f32.mrb[1].mxu0 }
  0xf9   :  { %99 = vst [vmem:[%s257_s2] sm:$0xf] %v98_v28 }

// kernel: dsgr_forward.6
= control target key start
LH: loop header
LB: loop body
LE: loop exit
PB: predicated region body
PF: predicated region fallthrough
CT: control target
= control target key end

     0   :  { %s3433_s13 = smov 0   ;;  %s4479_s0 = inlined_call_operand.vmem [shape: f32[16,16], index: 0, kind: input, shape index: {}]   ;;  %s4480_s1 = inlined_call_operand.vmem [shape: bf16[16,16,128], index: 1, kind: input, shape index: {}]   ;;  %s4481_s2 = inlined_call_operand.vmem [shape: bf16[16,128], index: 2, kind: input, shape index: {}]   ;;  %s4482_s3 = inlined_call_operand.vmem [shape: f32[16,128], index: 3, kind: input, shape index: {}]   ;;  %s4483_s4 = inlined_call_operand.vmem [shape: f32[128,16], index: 4, kind: input, shape index: {}]   ;;  %s4484_s5 = inlined_call_operand.vmem [shape: f32[16,128], index: 5, kind: input, shape index: {}]   ;;  %s4485_s6 = inlined_call_operand.vmem [shape: f32[128,128], index: 6, kind: input, shape index: {}]   ;;  %s4486_s7 = inlined_call_operand.vmem [shape: f32[128,128], index: 7, kind: input, shape index: {}]   ;;  %s4487_s8 = inlined_call_operand.vmem [shape: f32[128,128], index: 8, kind: input, shape index: {}]   ;;  %s4488_s9 = inlined_call_operand.vmem [shape: f32[128,128], index: 9, kind: input, shape index: {}]   ;;  %s4489_s10 = inlined_call_operand.vmem [shape: f32[16,128], index: 10, kind: output, shape index: {}]  }
   0x1 LB: > { %s3439_s14 = sadd.s32 4294967295, %s3371_s13   ;;  %p2876_p0 = scmp.ge.s32.totalorder %s3371_s13, 1  ;;  %s3371_s13 = sphi %s3433_s13, %s20_s13  }
   0x2   : > { %p341_p1 = scmp.lt.s32.totalorder %s3371_s13, 3 }
   0x4   : > { %p342_p2 = pnand %p2876_p0, %p341_p1 }
   0x6   : > { %345 = sbr.rel (%p342_p2) target bundleno = 1849 (0x739), region = 60 }
   0xd   : > { %p391_p3 = scmp.lt.s32.totalorder %s3439_s14, 1  ;;  %v450_v0 = vlaneseq  ;;  %v993_v1 = vld [vmem:[%s4483_s4] sm:$0xff]  ;;  %v994_v2 = vld [vmem:[%s4483_s4 + $0x8] sm:$0xff]  ;;  %v995_v3 = vld [vmem:[%s4483_s4 + $0x10] sm:$0xff]  ;;  %v4490_v4 = vmov 0.0|0.0   ;;  %vm3374_vm0 = vmmov 0  }
   0xe   : > { %3214 = vmatprep.subr.bf16.mxu0 %v4490_v4  ;;  %v3215_v5 = vpack.c.bf16 %v994_v2, %v993_v1  ;;  %v996_v6 = vld [vmem:[%s4483_s4 + $0x18] sm:$0xff]  ;;  %3238 = vmatprep.subr.bf16.mxu1 %v4490_v4  ;;  %v4492_v8 = vmov 0.0   ;;  %v997_v12 = vld [vmem:[%s4483_s4 + $0x20] sm:$0xff]  ;;  %v998_v13 = vld [vmem:[%s4483_s4 + $0x28] sm:$0xff]  ;;  %vm720_vm2 = vcmask 130048  }
   0xf   : > { %s3459_s23 = scalar_select %p391_p3, %s3439_s14, 1  ;;  %v3462_v7 = vshrl.u32 %v450_v0, 7  ;;  %3064 = vmatprep.mubr.msk.f32.mxu0 %vm3374_vm0, %v4492_v8  ;;  %3071 = vmatprep.mubr.msk.f32.mxu1 %vm3374_vm0, %v4492_v8  ;;  %v3218_v9 = vpack.c.bf16 %v996_v6, %v995_v3  ;;  %v3221_v17 = vpack.c.bf16 %v998_v13, %v997_v12  ;;  %v999_v18 = vld [vmem:[%s4483_s4 + $0x30] sm:$0xff]  ;;  %v1000_v19 = vld [vmem:[%s4483_s4 + $0x38] sm:$0xff]  ;;  %v1001_v22 = vld [vmem:[%s4483_s4 + $0x40] sm:$0xff]  ;;  %v3571_v47 = vand.u32 127, %v450_v0 }
  0x10   : > { %3216 = vmatpush3.bf16.msra.mxu0 %v3215_v5  ;;  %v3224_v21 = vpack.c.bf16 %v1000_v19, %v999_v18  ;;  %v1002_v23 = vld [vmem:[%s4483_s4 + $0x48] sm:$0xff]  ;;  %v1003_v27 = vld [vmem:[%s4483_s4 + $0x50] sm:$0xff]  ;;  %v1004_v28 = vld [vmem:[%s4483_s4 + $0x58] sm:$0xff]  ;;  %v3376_v50 = vmov 1966171168  }
  0x11   : > { %s3469_s24 = sshll.u32 %s3459_s23, 3  ;;  %v3472_v10 = vsub.s32 1, %v3462_v7  ;;  %v3475_v11 = vsub.s32 0, %v3462_v7  ;;  %3217 = vmatprep.subr.bf16.mxu0 %v4490_v4  ;;  %v3502_v20 = vsub.s32 2, %v3462_v7  ;;  %v3514_v25 = vsub.s32 3, %v3462_v7  ;;  %v1005_v32 = vld [vmem:[%s4483_s4 + $0x60] sm:$0xff] }
  0x12   : > { %s394_s11 = scalar_lea.vmem %s4479_s0, %s3469_s24  ;;  %v3227_v26 = vpack.c.bf16 %v1002_v23, %v1001_v22  ;;  %v3526_v30 = vsub.s32 4, %v3462_v7  ;;  %v3230_v31 = vpack.c.bf16 %v1004_v28, %v1003_v27  ;;  %v1006_v33 = vld [vmem:[%s4483_s4 + $0x68] sm:$0xff]  ;;  %v3538_v35 = vsub.s32 5, %v3462_v7  ;;  %s2881_s12 = sshll.u32 %s3459_s23, 2  ;;  %v1007_v37 = vld [vmem:[%s4483_s4 + $0x70] sm:$0xff]  ;;  %v1008_v38 = vld [vmem:[%s4483_s4 + $0x78] sm:$0xff] }
  0x13   : > { %v3488_v14 = vld [vmem:[%s394_s11] sm:$0xff]  ;;  %v3233_v36 = vpack.c.bf16 %v1006_v33, %v1005_v32  ;;  %s405_s21 = scalar_lea.vmem %s4481_s2, %s2881_s12  ;;  %v3554_v40 = vsub.s32 6, %v3462_v7  ;;  %v3236_v41 = vpack.c.bf16 %v1008_v38, %v1007_v37  ;;  %v3560_v44 = vsub.s32 7, %v3462_v7  ;;  %s2878_s23 = sshll.u32 %s3439_s14, 3 }
  0x14   : > { %v522_v15 = vrot.slane %v3488_v14, %v3472_v10  ;;  %v511_v16 = vrot.slane %v3488_v14, %v3475_v11  ;;  %3219 = vmatpush3.bf16.msra.mxu0 %v3218_v9  ;;  %v533_v24 = vrot.slane %v3488_v14, %v3502_v20  ;;  %v544_v29 = vrot.slane %v3488_v14, %v3514_v25  ;;  %v447_v42 = vld [vmem:[%s405_s21] sm:$0xf]  ;;  %p396_p4 = scmp.lt.s32.totalorder %s2878_s23, 15  ;;  %s409_s25 = scalar_lea.vmem %s4482_s3, %s3469_s24 }
  0x15   : > { %3220 = vmatprep.subr.bf16.mxu0 %v4490_v4  ;;  %v555_v34 = vrot.slane %v3488_v14, %v3526_v30  ;;  %v566_v39 = vrot.slane %v3488_v14, %v3538_v35  ;;  %v577_v43 = vrot.slane %v3488_v14, %v3554_v40  ;;  %v3562_v45 = vunpack.c.l.bf16 %v447_v42  ;;  %s413_s20 = scalar_lea.vmem %s4489_s10, %s3469_s24 }
  0x16   : > { %524 = vbcast.lane.b32.xlu1 %v522_v15, 256  ;;  %513 = vbcast.lane.b32.xlu0 %v511_v16, 256  ;;  %v588_v46 = vrot.slane %v3488_v14, %v3560_v44  ;;  %vm452_vm1 = vcmp.lt.s32.totalorder %v3571_v47, 8  ;;  %v461_v51 = vunpack.c.l.s4 %v3376_v50  ;;  %v455_v60 = vadd.s32 8, %v3462_v7  ;;  %s4585_s23 = smov (!%p396_p4, %s2878_s23), 15 }
  0x17   : > { %v1881_v48 = vsel %vm452_vm1, %v3488_v14, -1e+30  ;;  %v459_v0 = vcombine.high %v3488_v14, %v3488_v14  ;;  %vm3592_vm3 = vcmp.lt.s32.totalorder %v3571_v47, %v3462_v7  ;;  %s2904_s14 = sshll.u32 %s4585_s23, 3 }
  0x18   : > { %3222 = vmatpush3.bf16.msra.mxu0 %v3221_v17  ;;  %v1882_v49 = vsel %vm720_vm2, %v1881_v48, -inf  ;;  %v462_v52 = vunpack.c.0.s8 %v461_v51  ;;  %vm3603_vm10 = vcmp.lt.s32.totalorder %v3571_v47, %v455_v60  ;;  %s3734_s26 = scalar_lea.vmem %s4480_s1, %s2904_s14 }
  0x19   : > { %3223 = vmatprep.subr.bf16.mxu0 %v4490_v4 }
  0x1a   : > { %528 = vbcast.lane.b32.xlu1 %v522_v15, 264  ;;  %517 = vbcast.lane.b32.xlu0 %v511_v16, 264  ;;  %v3579_v53 = vsub.s32 %v462_v52, %v3462_v7  ;;  %v3377_v15 = vmov 0  }
  0x1c   : > { %3225 = vmatpush3.bf16.msra.mxu0 %v3224_v21  ;;  %v466_v54 = vrot.slane %v3488_v14, %v3579_v53  ;;  %v3611_v12 = vrot.slane %v459_v0, %v3579_v53 }
  0x1d   : > { %3226 = vmatprep.subr.bf16.mxu0 %v4490_v4 }
  0x1e   : > { %539 = vbcast.lane.b32.xlu1 %v533_v24, 264  ;;  %535 = vbcast.lane.b32.xlu0 %v533_v24, 256  ;;  %v474_v55 = vcombine.high %v466_v54, %v466_v54  ;;  %v482_v57 = vrot.slane %v466_v54, %v3579_v53  ;;  %v3628_v24 = vrot.slane %v3611_v12, %v3579_v53 }
  0x20   : > { %3228 = vmatpush3.bf16.msra.mxu0 %v3227_v26  ;;  %v496_v56 = vrot.slane %v474_v55, %v3579_v53  ;;  %v599_v59 = vrot.slane %v482_v57, %v3475_v11  ;;  %v504_v63 = vcombine.high %v482_v57, %v482_v57 }
  0x21   : > { %3229 = vmatprep.subr.bf16.mxu0 %v4490_v4 }
  0x22   : > { %546 = vbcast.lane.b32.xlu0 %v544_v29, 256  ;;  %550 = vbcast.lane.b32.xlu1 %v544_v29, 264  ;;  %v603_v58 = vrot.slane %v496_v56, %v3475_v11  ;;  %v607_v9 = vrot.slane %v504_v63, %v3475_v11  ;;  %v506_v13 = vcombine.high %v496_v56, %v496_v56 }
  0x24   : > { %3231 = vmatpush3.bf16.msra.mxu0 %v3230_v31  ;;  %v611_v26 = vrot.slane %v506_v13, %v3475_v11 }
  0x25   : > { %3232 = vmatprep.subr.bf16.mxu0 %v4490_v4 }
  0x26   : > { %557 = vbcast.lane.b32.xlu0 %v555_v34, 256  ;;  %561 = vbcast.lane.b32.xlu1 %v555_v34, 264 }
  0x28   : > { %3234 = vmatpush3.bf16.msra.mxu0 %v3233_v36 }
  0x29   : > { %3235 = vmatprep.subr.bf16.mxu0 %v4490_v4 }
  0x2a   : > { %568 = vbcast.lane.b32.xlu0 %v566_v39, 256  ;;  %572 = vbcast.lane.b32.xlu1 %v566_v39, 264  ;;  %v615_v39 = vrot.slane %v3628_v24, %v3475_v11 }
  0x2c   : > { %3237 = vmatpush3.bf16.msra.mxu0 %v3236_v41  ;;  %v475_v41 = vcombine.high %v3611_v12, %v3611_v12 }
  0x2d   : > { %3289 = vmatprep.subr.bf16.mxu0 %v4490_v4 }
  0x2e   : > { %579 = vbcast.lane.b32.xlu0 %v577_v43, 256  ;;  %583 = vbcast.lane.b32.xlu1 %v577_v43, 264  ;;  %v3662_v56 = vrot.slane %v475_v41, %v3579_v53 }
  0x2f   : > { %3065 = vmatmul.mubr.f32.vlgmr.msra.gmra.mrb[0].mxu0 %v3562_v45 }
  0x30   : > { %3176 = vmatprep.mubr.msk.f32.mxu0 %vm3374_vm0, %v4492_v8  ;;  %v619_v63 = vrot.slane %v3662_v56, %v3475_v11  ;;  %v507_v41 = vcombine.high %v3662_v56, %v3662_v56 }
  0x32   : > { %590 = vbcast.lane.b32.xlu0 %v588_v46, 256  ;;  %594 = vbcast.lane.b32.xlu1 %v588_v46, 264 }
  0x51   : > { %1883 = vmax.xlane.f32.xlu0 %v1882_v49 }
  0x88   : > { %v525_v61 = vpop.permute.xlu1 %524  ;;  %v514_v62 = vpop.permute.xlu0 %513 }
  0x89   : > { %vm638_vm4 = vcmp.lt.f32.partialorder %v603_v58, %v525_v61  ;;  %vm654_vm5 = vcmp.eq.f32.partialorder %v603_v58, %v525_v61  ;;  %vm652_vm6 = vcmp.eq.f32.partialorder %v599_v59, %v514_v62  ;;  %vm636_vm8 = vcmp.lt.f32.partialorder %v599_v59, %v514_v62 }
  0x8a   : > { %vm674_vm7 = vmand %vm654_vm5, %vm3592_vm3 }
  0x8b   : > { %vm3598_vm9 = vmor %vm638_vm4, %vm674_vm7 }
  0x8c   : > { %vm672_vm11 = vmand %vm652_vm6, %vm3592_vm3  ;;  %v529_v5 = vpop.permute.xlu1 %528  ;;  %v518_v6 = vpop.permute.xlu0 %517  ;;  %v706_v23 = vsel %vm3598_vm9, 1, %v3377_v15 }
  0x8d   : > { %vm688_vm12 = vmor %vm636_vm8, %vm672_vm11  ;;  %vm639_vm13 = vcmp.lt.f32.partialorder %v603_v58, %v529_v5  ;;  %vm655_vm14 = vcmp.eq.f32.partialorder %v603_v58, %v529_v5  ;;  %vm653_vm15 = vcmp.eq.f32.partialorder %v599_v59, %v518_v6  ;;  %vm637_vm5 = vcmp.lt.f32.partialorder %v599_v59, %v518_v6 }
  0x8e   : > { %vm675_vm4 = vmand %vm655_vm14, %vm3603_vm10  ;;  %v704_v16 = vsel %vm688_vm12, 1, %v3377_v15  ;;  %v3637_v33 = vsel %vm720_vm2, %v706_v23, 0 }
  0x8f   : > { %vm691_vm6 = vmor %vm639_vm13, %vm675_vm4  ;;  %v3617_v17 = vsel %vm720_vm2, %v704_v16, 0  ;;  %v749_v49 = vshrl.u32 %v3637_v33, 16  ;;  %v505_v16 = vcombine.high %v3628_v24, %v3628_v24 }
  0x90   : > { %vm673_vm7 = vmand %vm653_vm15, %vm3603_vm10  ;;  %v540_v18 = vpop.permute.xlu1 %539  ;;  %v723_v19 = vshrl.u32 %v3617_v17, 16  ;;  %v536_v21 = vpop.permute.xlu0 %535  ;;  %v707_v22 = vsel %vm691_vm6, 1, %v3377_v15  ;;  %v722_v5 = vand.u32 65535, %v3617_v17 }
  0x91   : > { %vm689_vm8 = vmor %vm637_vm5, %vm673_vm7  ;;  %vm641_vm11 = vcmp.lt.f32.partialorder %v607_v9, %v540_v18  ;;  %vm657_vm12 = vcmp.eq.f32.partialorder %v607_v9, %v540_v18  ;;  %vm656_vm13 = vcmp.eq.f32.partialorder %v607_v9, %v536_v21  ;;  %vm640_vm15 = vcmp.lt.f32.partialorder %v607_v9, %v536_v21 }
  0x92   : > { %vm677_vm14 = vmand %vm657_vm12, %vm3603_vm10  ;;  %v725_v27 = vcvt.s32.f32 %v723_v19  ;;  %v705_v28 = vsel %vm689_vm8, 1, %v3377_v15  ;;  %v760_v29 = vsel %vm720_vm2, %v707_v22, 0  ;;  %v751_v57 = vcvt.s32.f32 %v749_v49 }
  0x93   : > { %vm693_vm9 = vmor %vm641_vm11, %vm677_vm14  ;;  %v734_v31 = vsel %vm720_vm2, %v705_v28, 0  ;;  %v762_v32 = vshrl.u32 %v760_v29, 16  ;;  %v761_v2 = vand.u32 65535, %v760_v29  ;;  %v724_v18 = vcvt.s32.f32 %v722_v5 }
  0x94   : > { %728 = vadd.xlane.f32.xlu1 %v725_v27  ;;  %vm676_vm4 = vmand %vm656_vm13, %vm3592_vm3  ;;  %v736_v34 = vshrl.u32 %v734_v31, 16  ;;  %v709_v36 = vsel %vm693_vm9, 1, %v3377_v15  ;;  %v551_v37 = vpop.permute.xlu1 %550  ;;  %v547_v38 = vpop.permute.xlu0 %546  ;;  %v735_v58 = vand.u32 65535, %v734_v31  ;;  %v748_v19 = vand.u32 65535, %v3637_v33 }
  0x95   : > { %vm692_vm5 = vmor %vm640_vm15, %vm676_vm4  ;;  %v764_v42 = vcvt.s32.f32 %v762_v32  ;;  %v3648_v43 = vsel %vm720_vm2, %v709_v36, 0  ;;  %vm643_vm6 = vcmp.lt.f32.partialorder %v611_v26, %v551_v37  ;;  %vm659_vm7 = vcmp.eq.f32.partialorder %v611_v26, %v551_v37 }
  0x96   : > { %v738_v46 = vcvt.s32.f32 %v736_v34  ;;  %v788_v48 = vshrl.u32 %v3648_v43, 16  ;;  %vm679_vm8 = vmand %vm659_vm7, %vm3603_vm10  ;;  %v708_v50 = vsel %vm692_vm5, 1, %v3377_v15  ;;  %vm658_vm12 = vcmp.eq.f32.partialorder %v611_v26, %v547_v38 }
  0x97   : > { %vm695_vm11 = vmor %vm643_vm6, %vm679_vm8  ;;  %v3656_v51 = vsel %vm720_vm2, %v708_v50, 0  ;;  %vm642_vm13 = vcmp.lt.f32.partialorder %v611_v26, %v547_v38  ;;  %v737_v0 = vcvt.s32.f32 %v735_v58  ;;  %v763_v17 = vcvt.s32.f32 %v761_v2 }
  0x98   : > { %741 = vadd.xlane.f32.xlu0 %v738_v46  ;;  %767 = vadd.xlane.f32.xlu1 %v764_v42  ;;  %v790_v52 = vcvt.s32.f32 %v788_v48  ;;  %v775_v54 = vshrl.u32 %v3656_v51, 16  ;;  %vm678_vm14 = vmand %vm658_vm12, %vm3592_vm3  ;;  %v562_v55 = vpop.permute.xlu1 %561  ;;  %v711_v59 = vsel %vm695_vm11, 1, %v3377_v15  ;;  %v558_v60 = vpop.permute.xlu0 %557  ;;  %v623_v24 = vrot.slane %v505_v16, %v3475_v11 }
  0x99   : > { %vm661_vm15 = vcmp.eq.f32.partialorder %v615_v39, %v562_v55  ;;  %vm694_vm9 = vmor %vm642_vm13, %vm678_vm14  ;;  %vm645_vm4 = vcmp.lt.f32.partialorder %v615_v39, %v562_v55  ;;  %v3668_v62 = vsel %vm720_vm2, %v711_v59, 0  ;;  %vm660_vm6 = vcmp.eq.f32.partialorder %v615_v39, %v558_v60 }
  0x9a   : > { %v777_v61 = vcvt.s32.f32 %v775_v54  ;;  %vm681_vm5 = vmand %vm661_vm15, %vm3603_vm10  ;;  %v710_v6 = vsel %vm694_vm9, 1, %v3377_v15  ;;  %v814_v12 = vshrl.u32 %v3668_v62, 16  ;;  %vm644_vm8 = vcmp.lt.f32.partialorder %v615_v39, %v558_v60 }
  0x9b   : > { %vm697_vm7 = vmor %vm645_vm4, %vm681_vm5  ;;  %v3678_v13 = vsel %vm720_vm2, %v710_v6, 0  ;;  %v750_v28 = vcvt.s32.f32 %v748_v19  ;;  %v787_v29 = vand.u32 65535, %v3648_v43  ;;  %v774_v38 = vand.u32 65535, %v3656_v51 }
  0x9c   : > { %793 = vadd.xlane.f32.xlu1 %v790_v52  ;;  %754 = vadd.xlane.f32.xlu0 %v751_v57  ;;  %v573_v9 = vpop.permute.xlu1 %572  ;;  %vm680_vm11 = vmand %vm660_vm6, %vm3592_vm3  ;;  %v713_v21 = vsel %vm697_vm7, 1, %v3377_v15  ;;  %v569_v22 = vpop.permute.xlu0 %568  ;;  %v816_v23 = vcvt.s32.f32 %v814_v12  ;;  %v801_v26 = vshrl.u32 %v3678_v13, 16  ;;  %v813_v50 = vand.u32 65535, %v3668_v62 }
  0x9d   : > { %vm663_vm12 = vcmp.eq.f32.partialorder %v619_v63, %v573_v9  ;;  %vm696_vm13 = vmor %vm644_vm8, %vm680_vm11  ;;  %vm647_vm14 = vcmp.lt.f32.partialorder %v619_v63, %v573_v9  ;;  %v3688_v27 = vsel %vm720_vm2, %v713_v21, 0  ;;  %vm662_vm9 = vcmp.eq.f32.partialorder %v619_v63, %v569_v22 }
  0x9e   : > { %vm683_vm15 = vmand %vm663_vm12, %vm3603_vm10  ;;  %v712_v31 = vsel %vm696_vm13, 1, %v3377_v15  ;;  %v803_v33 = vcvt.s32.f32 %v801_v26  ;;  %v840_v34 = vshrl.u32 %v3688_v27, 16  ;;  %vm646_vm5 = vcmp.lt.f32.partialorder %v619_v63, %v569_v22 }
  0x9f   : > { %vm699_vm4 = vmor %vm647_vm14, %vm683_vm15  ;;  %v3697_v36 = vsel %vm720_vm2, %v712_v31, 0  ;;  %v789_v37 = vcvt.s32.f32 %v787_v29  ;;  %v776_v49 = vcvt.s32.f32 %v774_v38  ;;  %v627_v54 = vrot.slane %v507_v41, %v3475_v11 }
  0xa0   : > { %739 = vadd.xlane.f32.xlu1 %v737_v0  ;;  %780 = vadd.xlane.f32.xlu0 %v777_v61  ;;  %v584_v32 = vpop.permute.xlu1 %583  ;;  %vm682_vm6 = vmand %vm662_vm9, %vm3592_vm3  ;;  %v715_v39 = vsel %vm699_vm4, 1, %v3377_v15  ;;  %v842_v42 = vcvt.s32.f32 %v840_v34  ;;  %v827_v43 = vshrl.u32 %v3697_v36, 16  ;;  %v580_v46 = vpop.permute.xlu0 %579  ;;  %v815_v58 = vcvt.s32.f32 %v813_v50 }
  0xa1   : > { %vm665_vm7 = vcmp.eq.f32.partialorder %v623_v24, %v584_v32  ;;  %vm698_vm8 = vmor %vm646_vm5, %vm682_vm6  ;;  %vm649_vm11 = vcmp.lt.f32.partialorder %v623_v24, %v584_v32  ;;  %v864_v48 = vsel %vm720_vm2, %v715_v39, 0  ;;  %vm664_vm14 = vcmp.eq.f32.partialorder %v623_v24, %v580_v46 }
  0xa2   : > { %vm685_vm12 = vmand %vm665_vm7, %vm3603_vm10  ;;  %v714_v51 = vsel %vm698_vm8, 1, %v3377_v15  ;;  %v829_v55 = vcvt.s32.f32 %v827_v43  ;;  %v866_v56 = vshrl.u32 %v864_v48, 16  ;;  %vm648_vm9 = vcmp.lt.f32.partialorder %v623_v24, %v580_v46  ;;  %v2906_v43 = vld [vmem:[%s3734_s26] sm:$0xff]  }
  0xa3   : > { %vm701_vm13 = vmor %vm649_vm11, %vm685_vm12  ;;  %v851_v57 = vsel %vm720_vm2, %v714_v51, 0  ;;  %v800_v59 = vand.u32 65535, %v3678_v13  ;;  %v839_v5 = vand.u32 65535, %v3688_v27  ;;  %v826_v13 = vand.u32 65535, %v3697_v36 }
  0xa4   : > { %765 = vadd.xlane.f32.xlu1 %v763_v17  ;;  %726 = vadd.xlane.f32.xlu0 %v724_v18  ;;  %v595_v52 = vpop.permute.xlu1 %594  ;;  %vm684_vm4 = vmand %vm664_vm14, %vm3592_vm3  ;;  %v717_v60 = vsel %vm701_vm13, 1, %v3377_v15  ;;  %v868_v61 = vcvt.s32.f32 %v866_v56  ;;  %v591_v62 = vpop.permute.xlu0 %590  ;;  %v853_v63 = vshrl.u32 %v851_v57, 16  ;;  %v865_v22 = vand.u32 65535, %v864_v48 }
  0xa5   : > { %vm667_vm15 = vcmp.eq.f32.partialorder %v627_v54, %v595_v52  ;;  %vm651_vm5 = vcmp.lt.f32.partialorder %v627_v54, %v595_v52  ;;  %vm700_vm7 = vmor %vm648_vm9, %vm684_vm4  ;;  %v890_v0 = vsel %vm720_vm2, %v717_v60, 0  ;;  %v802_v2 = vcvt.s32.f32 %v800_v59 }
  0xa6   : > { %vm687_vm6 = vmand %vm667_vm15, %vm3603_vm10  ;;  %vm666_vm8 = vcmp.eq.f32.partialorder %v627_v54, %v591_v62  ;;  %v855_v6 = vcvt.s32.f32 %v853_v63  ;;  %v892_v9 = vshrl.u32 %v890_v0, 16  ;;  %v716_v12 = vsel %vm700_vm7, 1, %v3377_v15 }
  0xa7   : > { %vm703_vm11 = vmor %vm651_vm5, %vm687_vm6  ;;  %vm650_vm12 = vcmp.lt.f32.partialorder %v627_v54, %v591_v62  ;;  %v841_v3 = vcvt.s32.f32 %v839_v5  ;;  %v877_v17 = vsel %vm720_vm2, %v716_v12, 0  ;;  %v828_v21 = vcvt.s32.f32 %v826_v13  ;;  %v2937_v54 = vld [vmem:[%s3734_s26 + $0x8] sm:$0xff]   ;;  %v2938_v62 = vld [vmem:[%s3734_s26 + $0x10] sm:$0xff]  }
  0xa8   : > { %752 = vadd.xlane.f32.xlu0 %v750_v28  ;;  %819 = vadd.xlane.f32.xlu1 %v816_v23  ;;  %vm686_vm13 = vmand %vm666_vm8, %vm3592_vm3  ;;  %v719_v16 = vsel %vm703_vm11, 1, %v3377_v15  ;;  %v894_v18 = vcvt.s32.f32 %v892_v9  ;;  %v879_v23 = vshrl.u32 %v877_v17, 16  ;;  %v867_v27 = vcvt.s32.f32 %v865_v22  ;;  %v2939_v12 = vld [vmem:[%s3734_s26 + $0x18] sm:$0xff]   ;;  %v2940_v22 = vld [vmem:[%s3734_s26 + $0x20] sm:$0xff]  }
  0xa9   : > { %vm702_vm10 = vmor %vm650_vm12, %vm686_vm13  ;;  %v916_v19 = vsel %vm720_vm2, %v719_v16, 0  ;;  %v852_v28 = vand.u32 65535, %v851_v57  ;;  %v1087_v32 = vrot.slane %v3562_v45, %v3579_v53  ;;  %v891_v34 = vand.u32 65535, %v890_v0 }
  0xaa   : > { %v918_v1 = vshrl.u32 %v916_v19, 16  ;;  %v718_v26 = vsel %vm702_vm10, 1, %v3377_v15  ;;  %v881_v24 = vcvt.s32.f32 %v879_v23  ;;  %v917_v41 = vand.u32 65535, %v916_v19 }
  0xab   : > { %v903_v29 = vsel %vm720_vm2, %v718_v26, 0  ;;  %v1103_v15 = vrot.slane %v1087_v32, %v3579_v53  ;;  %v893_v38 = vcvt.s32.f32 %v891_v34  ;;  %v3738_v46 = vunpack.c.l.bf16 %v2906_v43 }
  0xac   : > { %791 = vadd.xlane.f32.xlu1 %v789_v37  ;;  %806 = vadd.xlane.f32.xlu0 %v803_v33  ;;  %v920_v31 = vcvt.s32.f32 %v918_v1  ;;  %v854_v33 = vcvt.s32.f32 %v852_v28  ;;  %v905_v36 = vshrl.u32 %v903_v29, 16  ;;  %v1095_v37 = vcombine.high %v1087_v32, %v1087_v32 }
  0xad   : > { %v1132_v48 = vrot.slane %v1103_v15, %v3475_v11  ;;  %v904_v51 = vand.u32 65535, %v903_v29  ;;  %v3746_v57 = vunpack.c.l.bf16 %v2937_v54  ;;  %v3753_v0 = vunpack.c.h.bf16 %v2937_v54 }
  0xae   : > { %v907_v39 = vcvt.s32.f32 %v905_v36  ;;  %v1117_v52 = vrot.slane %v1095_v37, %v3579_v53  ;;  %v3756_v5 = vunpack.c.l.bf16 %v2938_v62  ;;  %v3762_v13 = vunpack.c.h.bf16 %v2938_v62 }
  0xaf   : > { %v1169_v56 = vmul.f32 %v3738_v46, %v1132_v48  ;;  %v906_v59 = vcvt.s32.f32 %v904_v51  ;;  %v3771_v1 = vunpack.c.h.bf16 %v2939_v12  ;;  %v3787_v34 = vunpack.c.h.bf16 %v2940_v22 }
  0xb0   : > { %778 = vadd.xlane.f32.xlu0 %v776_v49  ;;  %845 = vadd.xlane.f32.xlu1 %v842_v42  ;;  %v878_v42 = vand.u32 65535, %v877_v17  ;;  %v919_v49 = vcvt.s32.f32 %v917_v41  ;;  %v1136_v60 = vrot.slane %v1117_v52, %v3475_v11  ;;  %v1127_v9 = vcombine.high %v1117_v52, %v1117_v52  ;;  %v2943_v52 = vld [vmem:[%s3734_s26 + $0x38] sm:$0xff]  }
  0xb1   : > { %v3765_v17 = vunpack.c.l.bf16 %v2939_v12  ;;  %4533 = vst [vmem:[#allocation2_spill] sm:$0xff] %v3787_v34 }
  0xb2   : > { %v880_v50 = vcvt.s32.f32 %v878_v42 }
  0xb4   : > { %817 = vadd.xlane.f32.xlu1 %v815_v58  ;;  %832 = vadd.xlane.f32.xlu0 %v829_v55  ;;  %v3743_v55 = vunpack.c.h.bf16 %v2906_v43  ;;  %v1080_v58 = vcombine.high %v3562_v45, %v3562_v45 }
  0xb6   : > { %v1170_v63 = vmul.f32 %v3743_v55, %v1132_v48  ;;  %v1094_v45 = vrot.slane %v1080_v58, %v3579_v53 }
  0xb8   : > { %804 = vadd.xlane.f32.xlu0 %v802_v2  ;;  %871 = vadd.xlane.f32.xlu1 %v868_v61  ;;  %v1125_v61 = vcombine.high %v1103_v15, %v1103_v15  ;;  %v1171_v2 = vmul.f32 %v3746_v57, %v1136_v60  ;;  %v1110_v19 = vrot.slane %v1094_v45, %v3579_v53 }
  0xba   : > { %v1148_v28 = vrot.slane %v1110_v19, %v3475_v11 }
  0xbc   : > { %843 = vadd.xlane.f32.xlu1 %v841_v3  ;;  %858 = vadd.xlane.f32.xlu0 %v855_v6  ;;  %v1140_v6 = vrot.slane %v1125_v61, %v3475_v11  ;;  %v1172_v3 = vmul.f32 %v3753_v0, %v1136_v60  ;;  %v1178_v41 = vmul.f32 %v3787_v34, %v1148_v28 }
  0xbe   : > { %v1173_v16 = vmul.f32 %v3756_v5, %v1140_v6  ;;  %v1174_v23 = vmul.f32 %v3762_v13, %v1140_v6  ;;  %v3821_v6 = vunpack.c.h.bf16 %v2943_v52 }
  0xc0   : > { %897 = vadd.xlane.f32.xlu1 %v894_v18  ;;  %830 = vadd.xlane.f32.xlu0 %v828_v21  ;;  %v1144_v18 = vrot.slane %v1127_v9, %v3475_v11  ;;  %v1096_v21 = vcombine.high %v1094_v45, %v1094_v45  ;;  %4539 = vst [vmem:[#allocation8_spill] sm:$0xff] %v3821_v6 }
  0xc2   : > { %v1175_v26 = vmul.f32 %v3765_v17, %v1144_v18  ;;  %v1124_v29 = vrot.slane %v1096_v21, %v3579_v53  ;;  %v1176_v32 = vmul.f32 %v3771_v1, %v1144_v18 }
  0xc4   : > { %869 = vadd.xlane.f32.xlu1 %v867_v27  ;;  %884 = vadd.xlane.f32.xlu0 %v881_v24  ;;  %v3774_v27 = vunpack.c.l.bf16 %v2940_v22  ;;  %v1152_v37 = vrot.slane %v1124_v29, %v3475_v11  ;;  %v1128_v51 = vcombine.high %v1124_v29, %v1124_v29 }
  0xc6   : > { %v1177_v36 = vmul.f32 %v3774_v27, %v1148_v28  ;;  %v1160_v60 = vrot.slane %v1128_v51, %v3475_v11 }
  0xc8   : > { %856 = vadd.xlane.f32.xlu0 %v854_v33  ;;  %923 = vadd.xlane.f32.xlu1 %v920_v31  ;;  %v2941_v31 = vld [vmem:[%s3734_s26 + $0x28] sm:$0xff]   ;;  %v1184_v9 = vmul.f32 %v3821_v6, %v1160_v60 }
  0xc9   : > { %v3790_v15 = vunpack.c.l.bf16 %v2941_v31  ;;  %v3798_v42 = vunpack.c.h.bf16 %v2941_v31 }
  0xcb   : > { %4534 = vst [vmem:[#allocation3_spill] sm:$0xff] %v3790_v15  ;;  %4535 = vst [vmem:[#allocation4_spill] sm:$0xff] %v3798_v42  ;;  %v1179_v43 = vmul.f32 %v3790_v15, %v1152_v37  ;;  %v1180_v54 = vmul.f32 %v3798_v42, %v1152_v37 }
  0xcc   : > { %895 = vadd.xlane.f32.xlu1 %v893_v38  ;;  %910 = vadd.xlane.f32.xlu0 %v907_v39  ;;  %v1126_v38 = vcombine.high %v1110_v19, %v1110_v19  ;;  %v2942_v39 = vld [vmem:[%s3734_s26 + $0x30] sm:$0xff]  }
  0xcd   : > { %v3801_v48 = vunpack.c.l.bf16 %v2942_v39  ;;  %v3816_v62 = vunpack.c.h.bf16 %v2942_v39 }
  0xcf   : > { %4536 = vst [vmem:[#allocation5_spill] sm:$0xff] %v3801_v48  ;;  %4538 = vst [vmem:[#allocation7_spill] sm:$0xff] %v3816_v62 }
  0xd0   : > { %921 = vadd.xlane.f32.xlu1 %v919_v49  ;;  %882 = vadd.xlane.f32.xlu0 %v880_v50  ;;  %v1156_v50 = vrot.slane %v1126_v38, %v3475_v11 }
  0xd2   : > { %v1181_v58 = vmul.f32 %v3801_v48, %v1156_v50 }
  0xd4   : > { %908 = vadd.xlane.f32.xlu0 %v906_v59  ;;  %1185 = vadd.xlane.f32.xlu1 %v1169_v56  ;;  %v3811_v59 = vunpack.c.l.bf16 %v2943_v52 }
  0xd6   : > { %4537 = vst [vmem:[#allocation6_spill] sm:$0xff] %v3811_v59 }
  0xd8   : > { %1187 = vadd.xlane.f32.xlu0 %v1170_v63  ;;  %1189 = vadd.xlane.f32.xlu1 %v1171_v2  ;;  %v1183_v63 = vmul.f32 %v3811_v59, %v1160_v60  ;;  %v1182_v2 = vmul.f32 %v3816_v62, %v1156_v50  ;;  %v3962_v62 = vsub.s32 %v3571_v47, %v3462_v7 }
  0xdc   : > { %1191 = vadd.xlane.f32.xlu0 %v1172_v3  ;;  %1193 = vadd.xlane.f32.xlu1 %v1173_v16 }
  0xde   : > { %v1884_v24 = vpop.xlane.xlu0 %1883 }
  0xdf   : > { %vm1885_vm3 = vcmp.eq.f32.partialorder %v3488_v14, %v1884_v24 }
  0xe0   : > { %1195 = vadd.xlane.f32.xlu0 %v1174_v23  ;;  %vm3783_vm14 = vmand %vm452_vm1, %vm1885_vm3  ;;  %1197 = vadd.xlane.f32.xlu1 %v1175_v26 }
  0xe1   : > { %v1887_v14 = vsel %vm3783_vm14, %v3571_v47, 16 }
  0xe2   : > { %v3804_v49 = vsel %vm720_vm2, %v1887_v14, 2147483647 }
  0xe3   : > { %v1890_v56 = vshra.s32 %v3804_v49, 16 }
  0xe4   : > { %1199 = vadd.xlane.f32.xlu0 %v1176_v32  ;;  %1201 = vadd.xlane.f32.xlu1 %v1177_v36 }
  0xe5   : > { %v3814_v61 = vcvt.s32.f32 %v1890_v56 }
  0xe8   : > { %1203 = vadd.xlane.f32.xlu0 %v1178_v41  ;;  %1205 = vadd.xlane.f32.xlu1 %v1179_v43 }
  0xec   : > { %1207 = vadd.xlane.f32.xlu0 %v1180_v54  ;;  %1209 = vadd.xlane.f32.xlu1 %v1181_v58 }
  0xf0   : > { %1893 = vmin.xlane.f32.xlu0 %v3814_v61  ;;  %1213 = vadd.xlane.f32.xlu1 %v1183_v63 }
  0xf4   : > { %1211 = vadd.xlane.f32.xlu0 %v1182_v2 }
  0xf8   : > { %1215 = vadd.xlane.f32.xlu0 %v1184_v9 }
 0x102   : > { %v3824_v45 = vpop.f32.mrb[0].mxu0 }
 0x103   : > { %v3066_v12 = vpop.f32.mrb[1].mxu0  ;;  %v1225_v23 = vrot.slane %v3824_v45, %v3579_v53 }
 0x105   : > { %v1233_v33 = vcombine.high %v1225_v23, %v1225_v23  ;;  %v1241_v36 = vrot.slane %v1225_v23, %v3579_v53 }
 0x107   : > { %v3830_v54 = vrot.slane %v1233_v33, %v3579_v53  ;;  %v1270_v56 = vrot.slane %v1241_v36, %v3475_v11 }
 0x109   : > { %v1274_v23 = vrot.slane %v3830_v54, %v3475_v11 }
 0x121   : > { %v729_v3 = vpop.xlane.xlu1 %728 }
 0x122   : > { %v731_v26 = vcvt.f32.s32 %v729_v3 }
 0x124   : > { %v732_v37 = vshll.u32 %v731_v26, 16  ;;  %v1263_v26 = vcombine.high %v1241_v36, %v1241_v36 }
 0x125   : > { %v742_v16 = vpop.xlane.xlu0 %741  ;;  %v768_v18 = vpop.xlane.xlu1 %767 }
 0x126   : > { %v744_v22 = vcvt.f32.s32 %v742_v16  ;;  %v770_v24 = vcvt.f32.s32 %v768_v18 }
 0x128   : > { %v745_v31 = vshll.u32 %v744_v22, 16  ;;  %v771_v38 = vshll.u32 %v770_v24, 16 }
 0x129   : > { %v794_v19 = vpop.xlane.xlu1 %793  ;;  %v755_v21 = vpop.xlane.xlu0 %754 }
 0x12a   : > { %v757_v43 = vcvt.f32.s32 %v755_v21  ;;  %v796_v63 = vcvt.f32.s32 %v794_v19 }
 0x12c   : > { %v758_v3 = vshll.u32 %v757_v43, 16 }
 0x12d   : > { %v740_v28 = vpop.xlane.xlu1 %739  ;;  %v781_v29 = vpop.xlane.xlu0 %780 }
 0x12e   : > { %v743_v32 = vcvt.f32.s32 %v740_v28  ;;  %v783_v19 = vcvt.f32.s32 %v781_v29 }
 0x130   : > { %v746_v14 = vadd.s32 %v745_v31, %v743_v32 }
 0x131   : > { %v766_v39 = vpop.xlane.xlu1 %765  ;;  %v727_v41 = vpop.xlane.xlu0 %726 }
 0x132   : > { %v930_v50 = vsub.s32 15, %v746_v14  ;;  %v769_v51 = vcvt.f32.s32 %v766_v39  ;;  %v730_v52 = vcvt.f32.s32 %v727_v41 }
 0x134   : > { %v772_v58 = vadd.s32 %v771_v38, %v769_v51  ;;  %v733_v60 = vadd.s32 %v732_v37, %v730_v52  ;;  %vm946_vm15 = vcmp.eq.s32.totalorder %v930_v50, %v3571_v47  ;;  %v797_v37 = vshll.u32 %v796_v63, 16 }
 0x135   : > { %v753_v2 = vpop.xlane.xlu0 %752  ;;  %v820_v9 = vpop.xlane.xlu1 %819  ;;  %v3835_v12 = vsel %vm946_vm15, 1.0, %v4492_v8  ;;  %v784_v50 = vshll.u32 %v783_v19, 16  ;;  %v1278_v63 = vrot.slane %v1263_v26, %v3475_v11 }
 0x136   : > { %4540 = vst [vmem:[#allocation9_spill] sm:$0xff] %v3835_v12  ;;  %v932_v16 = vsub.s32 15, %v772_v58  ;;  %v929_v18 = vsub.s32 15, %v733_v60  ;;  %v756_v21 = vcvt.f32.s32 %v753_v2  ;;  %v1308_v22 = vmul.f32 %v3835_v12, %v1270_v56 }
 0x137   : > { %v822_v2 = vcvt.f32.s32 %v820_v9  ;;  %v1265_v9 = vcombine.high %v3830_v54, %v3830_v54 }
 0x138   : > { %v759_v24 = vadd.s32 %v758_v3, %v756_v21  ;;  %vm945_vm9 = vcmp.eq.s32.totalorder %v929_v18, %v3571_v47  ;;  %vm948_vm4 = vcmp.eq.s32.totalorder %v932_v16, %v3571_v47  ;;  %v1326_v32 = vsel %vm720_vm2, %v1308_v22, 0.0 }
 0x139   : > { %v792_v28 = vpop.xlane.xlu1 %791  ;;  %v807_v31 = vpop.xlane.xlu0 %806  ;;  %v3844_v33 = vsel %vm945_vm9, 1.0, %v4492_v8  ;;  %v3847_v14 = vsel %vm948_vm4, 1.0, %v4492_v8  ;;  %1327 = vadd.xlane.f32.xlu0 %v1326_v32  ;;  %v823_v26 = vshll.u32 %v822_v2, 16  ;;  %v1282_v54 = vrot.slane %v1265_v9, %v3475_v11 }
 0x13a   : > { %4541 = vst [vmem:[#allocation10_spill] sm:$0xff] %v3844_v33  ;;  %4542 = vst [vmem:[#allocation11_spill] sm:$0xff] %v3847_v14  ;;  %v931_v38 = vsub.s32 15, %v759_v24  ;;  %v795_v39 = vcvt.f32.s32 %v792_v28  ;;  %v1307_v36 = vmul.f32 %v3844_v33, %v1270_v56  ;;  %v1310_v41 = vmul.f32 %v3847_v14, %v1274_v23 }
 0x13b   : > { %v809_v22 = vcvt.f32.s32 %v807_v31 }
 0x13c   : > { %v798_v43 = vadd.s32 %v797_v37, %v795_v39  ;;  %v1323_v29 = vsel %vm720_vm2, %v1307_v36, 0.0  ;;  %vm947_vm5 = vcmp.eq.s32.totalorder %v931_v38, %v3571_v47  ;;  %v1332_v58 = vsel %vm720_vm2, %v1310_v41, 0.0 }
 0x13d   : > { %v779_v51 = vpop.xlane.xlu0 %778  ;;  %v846_v52 = vpop.xlane.xlu1 %845  ;;  %1324 = vadd.xlane.f32.xlu1 %v1323_v29  ;;  %v3855_v60 = vsel %vm947_vm5, 1.0, %v4492_v8  ;;  %1333 = vadd.xlane.f32.xlu0 %v1332_v58  ;;  %v1218_v38 = vcombine.high %v3824_v45, %v3824_v45  ;;  %v810_v36 = vshll.u32 %v809_v22, 16 }
 0x13e   : > { %4543 = vst [vmem:[#allocation12_spill] sm:$0xff] %v3855_v60  ;;  %v934_v56 = vsub.s32 15, %v798_v43  ;;  %v782_v3 = vcvt.f32.s32 %v779_v51  ;;  %v1309_v16 = vmul.f32 %v3855_v60, %v1274_v23 }
 0x13f   : > { %v1232_v45 = vrot.slane %v1218_v38, %v3579_v53 }
 0x140   : > { %v785_v18 = vadd.s32 %v784_v50, %v782_v3  ;;  %v1329_v21 = vsel %vm720_vm2, %v1309_v16, 0.0  ;;  %vm950_vm6 = vcmp.eq.s32.totalorder %v934_v56, %v3571_v47  ;;  %v848_v50 = vcvt.f32.s32 %v846_v52 }
 0x141   : > { %v818_v24 = vpop.xlane.xlu1 %817  ;;  %v833_v19 = vpop.xlane.xlu0 %832  ;;  %1330 = vadd.xlane.f32.xlu1 %v1329_v21  ;;  %v3862_v28 = vsel %vm950_vm6, 1.0, %v4492_v8  ;;  %vm1428_vm6 = vcmask 130112  }
 0x142   : > { %4544 = vst [vmem:[#allocation13_spill] sm:$0xff] %v3862_v28  ;;  %v933_v32 = vsub.s32 15, %v785_v18  ;;  %v821_v37 = vcvt.f32.s32 %v818_v24  ;;  %v1312_v23 = vmul.f32 %v3862_v28, %v1278_v63  ;;  %v835_v16 = vcvt.f32.s32 %v833_v19 }
 0x143   : > { %v849_v24 = vshll.u32 %v848_v50, 16 }
 0x144   : > { %v824_v39 = vadd.s32 %v823_v26, %v821_v37  ;;  %v1338_v31 = vsel %vm720_vm2, %v1312_v23, 0.0  ;;  %vm949_vm7 = vcmp.eq.s32.totalorder %v933_v32, %v3571_v47  ;;  %v836_v19 = vshll.u32 %v835_v16, 16 }
 0x145   : > { %v805_v41 = vpop.xlane.xlu0 %804  ;;  %v872_v43 = vpop.xlane.xlu1 %871  ;;  %1339 = vadd.xlane.f32.xlu0 %v1338_v31  ;;  %v3872_v29 = vsel %vm949_vm7, 1.0, %v4492_v8  ;;  %vm1493_vm7 = vcmask 1041409  }
 0x146   : > { %4545 = vst [vmem:[#allocation14_spill] sm:$0xff] %v3872_v29  ;;  %v936_v51 = vsub.s32 15, %v824_v39  ;;  %v808_v58 = vcvt.f32.s32 %v805_v41  ;;  %v1311_v2 = vmul.f32 %v3872_v29, %v1278_v63  ;;  %v3884_v63 = vrot.slane %v1232_v45, %v3579_v53 }
 0x147   : > { %v874_v31 = vcvt.f32.s32 %v872_v43 }
 0x148   : > { %v811_v56 = vadd.s32 %v810_v36, %v808_v58  ;;  %v1335_v3 = vsel %vm720_vm2, %v1311_v2, 0.0  ;;  %vm952_vm8 = vcmp.eq.s32.totalorder %v936_v51, %v3571_v47  ;;  %v1234_v51 = vcombine.high %v1232_v45, %v1232_v45 }
 0x149   : > { %v844_v18 = vpop.xlane.xlu1 %843  ;;  %v859_v21 = vpop.xlane.xlu0 %858  ;;  %1336 = vadd.xlane.f32.xlu1 %v1335_v3  ;;  %v3880_v22 = vsel %vm952_vm8, 1.0, %v4492_v8  ;;  %v875_v43 = vshll.u32 %v874_v31, 16  ;;  %vm1495_vm8 = vcmask 1042434  }
 0x14a   : > { %4546 = vst [vmem:[#allocation15_spill] sm:$0xff] %v3880_v22  ;;  %v935_v52 = vsub.s32 15, %v811_v56  ;;  %v847_v9 = vcvt.f32.s32 %v844_v18  ;;  %v1314_v26 = vmul.f32 %v3880_v22, %v1282_v54  ;;  %v1286_v56 = vrot.slane %v3884_v63, %v3475_v11 }
 0x14b   : > { %v861_v3 = vcvt.f32.s32 %v859_v21 }
 0x14c   : > { %v850_v32 = vadd.s32 %v849_v24, %v847_v9  ;;  %v1344_v37 = vsel %vm720_vm2, %v1314_v26, 0.0  ;;  %vm951_vm11 = vcmp.eq.s32.totalorder %v935_v52, %v3571_v47 }
 0x14d   : > { %v898_v23 = vpop.xlane.xlu1 %897  ;;  %v831_v38 = vpop.xlane.xlu0 %830  ;;  %1345 = vadd.xlane.f32.xlu0 %v1344_v37  ;;  %v3889_v39 = vsel %vm951_vm11, 1.0, %v4492_v8  ;;  %v862_v37 = vshll.u32 %v861_v3, 16  ;;  %vm1497_vm11 = vcmask 1043459  }
 0x14e   : > { %4547 = vst [vmem:[#allocation16_spill] sm:$0xff] %v3889_v39  ;;  %v938_v36 = vsub.s32 15, %v850_v32  ;;  %v834_v41 = vcvt.f32.s32 %v831_v38  ;;  %v1313_v50 = vmul.f32 %v3889_v39, %v1282_v54  ;;  %v1262_v32 = vrot.slane %v1234_v51, %v3579_v53 }
 0x150   : > { %v837_v58 = vadd.s32 %v836_v19, %v834_v41  ;;  %v1341_v2 = vsel %vm720_vm2, %v1313_v50, 0.0  ;;  %vm954_vm12 = vcmp.eq.s32.totalorder %v938_v36, %v3571_v47  ;;  %v900_v36 = vcvt.f32.s32 %v898_v23 }
 0x151   : > { %v870_v16 = vpop.xlane.xlu1 %869  ;;  %v885_v18 = vpop.xlane.xlu0 %884  ;;  %1342 = vadd.xlane.f32.xlu1 %v1341_v2  ;;  %v3897_v24 = vsel %vm954_vm12, 1.0, %v4492_v8  ;;  %vm1499_vm12 = vcmask 1044484  }
 0x152   : > { %4548 = vst [vmem:[#allocation17_spill] sm:$0xff] %v3897_v24  ;;  %v937_v52 = vsub.s32 15, %v837_v58  ;;  %v873_v9 = vcvt.f32.s32 %v870_v16  ;;  %v1316_v54 = vmul.f32 %v3897_v24, %v1286_v56  ;;  %v1290_v16 = vrot.slane %v1262_v32, %v3475_v11 }
 0x153   : > { %v887_v53 = vcvt.f32.s32 %v885_v18  ;;  %v901_v23 = vshll.u32 %v900_v36, 16 }
 0x154   : > { %v876_v45 = vadd.s32 %v875_v43, %v873_v9  ;;  %v1350_v26 = vsel %vm720_vm2, %v1316_v54, 0.0  ;;  %vm953_vm13 = vcmp.eq.s32.totalorder %v937_v52, %v3571_v47 }
 0x155   : > { %v857_v21 = vpop.xlane.xlu0 %856  ;;  %v924_v19 = vpop.xlane.xlu1 %923  ;;  %1351 = vadd.xlane.f32.xlu0 %v1350_v26  ;;  %v3904_v38 = vsel %vm953_vm13, 1.0, %v4492_v8  ;;  %v888_v18 = vshll.u32 %v887_v53, 16  ;;  %vm1501_vm13 = vcmask 1045509  }
 0x156   : > { %4549 = vst [vmem:[#allocation18_spill] sm:$0xff] %v3904_v38  ;;  %v940_v31 = vsub.s32 15, %v876_v45  ;;  %v860_v41 = vcvt.f32.s32 %v857_v21  ;;  %v1315_v50 = vmul.f32 %v3904_v38, %v1286_v56  ;;  %v926_v51 = vcvt.f32.s32 %v924_v19 }
 0x157   : > { %v1264_v45 = vcombine.high %v3884_v63, %v3884_v63 }
 0x158   : > { %v863_v58 = vadd.s32 %v862_v37, %v860_v41  ;;  %v1347_v2 = vsel %vm720_vm2, %v1315_v50, 0.0  ;;  %vm956_vm10 = vcmp.eq.s32.totalorder %v940_v31, %v3571_v47  ;;  %v927_v21 = vshll.u32 %v926_v51, 16 }
 0x159   : > { %v896_v3 = vpop.xlane.xlu1 %895  ;;  %1348 = vadd.xlane.f32.xlu1 %v1347_v2  ;;  %v911_v43 = vpop.xlane.xlu0 %910  ;;  %v3911_v52 = vsel %vm956_vm10, 1.0, %v4492_v8  ;;  %v1294_v63 = vrot.slane %v1264_v45, %v3475_v11  ;;  %vm1503_vm10 = vcmask 1046534  }
 0x15a   : > { %4550 = vst [vmem:[#allocation19_spill] sm:$0xff] %v3911_v52  ;;  %v939_v9 = vsub.s32 15, %v863_v58  ;;  %v899_v54 = vcvt.f32.s32 %v896_v3  ;;  %v1318_v56 = vmul.f32 %v3911_v52, %v1290_v16  ;;  %v913_v19 = vcvt.f32.s32 %v911_v43 }
 0x15c   : > { %v902_v26 = vadd.s32 %v901_v23, %v899_v54  ;;  %v1356_v37 = vsel %vm720_vm2, %v1318_v56, 0.0  ;;  %vm955_vm3 = vcmp.eq.s32.totalorder %v939_v9, %v3571_v47  ;;  %v1266_v23 = vcombine.high %v1262_v32, %v1262_v32 }
 0x15d   : > { %v922_v31 = vpop.xlane.xlu1 %921  ;;  %v883_v41 = vpop.xlane.xlu0 %882  ;;  %1357 = vadd.xlane.f32.xlu0 %v1356_v37  ;;  %v3919_v36 = vsel %vm955_vm3, 1.0, %v4492_v8  ;;  %v914_v51 = vshll.u32 %v913_v19, 16  ;;  %vm1505_vm3 = vcmask 1047559  }
 0x15e   : > { %4551 = vst [vmem:[#allocation20_spill] sm:$0xff] %v3919_v36  ;;  %v942_v50 = vsub.s32 15, %v902_v26  ;;  %v925_v58 = vcvt.f32.s32 %v922_v31  ;;  %v886_v2 = vcvt.f32.s32 %v883_v41  ;;  %v1317_v3 = vmul.f32 %v3919_v36, %v1290_v16 }
 0x15f   : > { %v1298_v45 = vrot.slane %v1266_v23, %v3475_v11  ;;  %v1423_v36 = vadd.s32 4294967288, %v3571_v47 }
 0x160   : > { %v928_v54 = vadd.s32 %v927_v21, %v925_v58  ;;  %v889_v56 = vadd.s32 %v888_v18, %v886_v2  ;;  %v1353_v53 = vsel %vm720_vm2, %v1317_v3, 0.0  ;;  %vm958_vm14 = vcmp.eq.s32.totalorder %v942_v50, %v3571_v47 }
 0x161   : > { %1354 = vadd.xlane.f32.xlu1 %v1353_v53  ;;  %v909_v43 = vpop.xlane.xlu0 %908  ;;  %v3926_v9 = vsel %vm958_vm14, 1.0, %v4492_v8  ;;  %v3958_v33 = vsub.s32 %v1423_v36, %v3462_v7 }
 0x162   : > { %4552 = vst [vmem:[#allocation21_spill] sm:$0xff] %v3926_v9  ;;  %v944_v26 = vsub.s32 15, %v928_v54  ;;  %v941_v37 = vsub.s32 15, %v889_v56  ;;  %v912_v31 = vcvt.f32.s32 %v909_v43  ;;  %v1320_v16 = vmul.f32 %v3926_v9, %v1294_v63 }
 0x164   : > { %v915_v32 = vadd.s32 %v914_v51, %v912_v31  ;;  %v1362_v18 = vsel %vm720_vm2, %v1320_v16, 0.0  ;;  %vm957_vm15 = vcmp.eq.s32.totalorder %v941_v37, %v3571_v47  ;;  %vm960_vm9 = vcmp.eq.s32.totalorder %v944_v26, %v3571_v47 }
 0x165   : > { %1363 = vadd.xlane.f32.xlu0 %v1362_v18  ;;  %v1188_v21 = vpop.xlane.xlu0 %1187  ;;  %v3934_v19 = vsel %vm957_vm15, 1.0, %v4492_v8  ;;  %v3937_v41 = vsel %vm960_vm9, 1.0, %v4492_v8  ;;  %v1889_v31 = vand.u32 65535, %v3804_v49 }
 0x166   : > { %4553 = vst [vmem:[#allocation22_spill] sm:$0xff] %v3934_v19  ;;  %4554 = vst [vmem:[#allocation23_spill] sm:$0xff] %v3937_v41  ;;  %v943_v50 = vsub.s32 15, %v915_v32  ;;  %v1319_v58 = vmul.f32 %v3934_v19, %v1294_v63  ;;  %v1322_v2 = vmul.f32 %v3937_v41, %v1298_v45 }
 0x167   : > { %v1891_v32 = vcvt.s32.f32 %v1889_v31 }
 0x168   : > { %v1359_v3 = vsel %vm720_vm2, %v1319_v58, 0.0  ;;  %v1368_v23 = vsel %vm720_vm2, %v1322_v2, 0.0  ;;  %vm959_vm4 = vcmp.eq.s32.totalorder %v943_v50, %v3571_v47  ;;  %v1186_v50 = vpop.xlane.xlu1 %1185 }
 0x169   : > { %1360 = vadd.xlane.f32.xlu1 %v1359_v3  ;;  %1369 = vadd.xlane.f32.xlu0 %v1368_v23  ;;  %v1192_v54 = vpop.xlane.xlu0 %1191  ;;  %v3945_v56 = vsel %vm959_vm4, 1.0, %v4492_v8 }
 0x16a   : > { %4555 = vst [vmem:[#allocation24_spill] sm:$0xff] %v3945_v56  ;;  %v1321_v53 = vmul.f32 %v3945_v56, %v1298_v45 }
 0x16c   : > { %v1365_v51 = vsel %vm720_vm2, %v1321_v53, 0.0  ;;  %v1190_v58 = vpop.xlane.xlu1 %1189 }
 0x16d   : > { %1366 = vadd.xlane.f32.xlu1 %v1365_v51  ;;  %v1196_v63 = vpop.xlane.xlu0 %1195 }
 0x170   : > { %v1194_v45 = vpop.xlane.xlu1 %1193 }
 0x171   : > { %v1200_v43 = vpop.xlane.xlu0 %1199 }
 0x174   : > { %v1198_v2 = vpop.xlane.xlu1 %1197 }
 0x175   : > { %v1204_v26 = vpop.xlane.xlu0 %1203 }
 0x178   : > { %v1202_v3 = vpop.xlane.xlu1 %1201 }
 0x179   : > { %v1208_v37 = vpop.xlane.xlu0 %1207 }
 0x17c   : > { %v1206_v23 = vpop.xlane.xlu1 %1205 }
 0x17d   : > { %v3950_v16 = vpop.xlane.xlu0 %1893 }
 0x17e   : > { %vm1895_vm5 = vcmp.eq.f32.partialorder %v3814_v61, %v3950_v16 }
 0x17f   : > { %v1896_v18 = vsel %vm1895_vm5, %v1891_v32, inf }
 0x180   : > { %1897 = vmin.xlane.f32.xlu1 %v1896_v18  ;;  %v1210_v51 = vpop.xlane.xlu1 %1209 }
 0x181   : > { %v1212_v53 = vpop.xlane.xlu0 %1211 }
 0x184   : > { %v3954_v8 = vpop.xlane.xlu1 %1213 }
 0x185   : > { %v1216_v4 = vpop.xlane.xlu0 %1215 }
 0x1c6   : > { %v1328_v49 = vpop.xlane.xlu0 %1327 }
 0x1c7   : > { %v1372_v24 = vadd.f32 %v1328_v49, %v1188_v21 }
 0x1c9   : > { %v1388_v48 = vmul.f32 0.17677669, %v1372_v24 }
 0x1ca   : > { %v1325_v41 = vpop.xlane.xlu1 %1324  ;;  %v1334_v56 = vpop.xlane.xlu0 %1333 }
 0x1cb   : > { %v1371_v22 = vadd.f32 %v1325_v41, %v1186_v50  ;;  %v1374_v60 = vadd.f32 %v1334_v56, %v1192_v54  ;;  %v1427_v24 = vrot.slane %v1388_v48, %v3958_v33 }
 0x1cd   : > { %v1390_v54 = vmul.f32 0.17677669, %v1374_v60 }
 0x1ce   : > { %v1331_v31 = vpop.xlane.xlu1 %1330 }
 0x1cf   : > { %v1373_v38 = vadd.f32 %v1331_v31, %v1190_v58  ;;  %v1387_v58 = vmul.f32 0.17677669, %v1371_v22 }
 0x1d1   : > { %v1389_v15 = vmul.f32 0.17677669, %v1373_v38 }
 0x1d2   : > { %v1340_v9 = vpop.xlane.xlu0 %1339 }
 0x1d3   : > { %v1376_v12 = vadd.f32 %v1340_v9, %v1196_v63  ;;  %v1433_v7 = vrot.slane %v1389_v15, %v3962_v62 }
 0x1d5   : > { %v1392_v56 = vmul.f32 0.17677669, %v1376_v12  ;;  %v1437_v12 = vrot.slane %v1390_v54, %v3958_v33 }
 0x1d6   : > { %v1337_v19 = vpop.xlane.xlu1 %1336 }
 0x1d7   : > { %v1375_v39 = vadd.f32 %v1337_v19, %v1194_v45  ;;  %v1446_v48 = vrot.slane %v1392_v56, %v3958_v33 }
 0x1d9   : > { %v1391_v41 = vmul.f32 0.17677669, %v1375_v39 }
 0x1da   : > { %v1346_v61 = vpop.xlane.xlu0 %1345 }
 0x1db   : > { %v1378_v59 = vadd.f32 %v1346_v61, %v1200_v43 }
 0x1dd   : > { %v1394_v9 = vmul.f32 0.17677669, %v1378_v59 }
 0x1de   : > { %v1343_v32 = vpop.xlane.xlu1 %1342 }
 0x1df   : > { %v1377_v28 = vadd.f32 %v1343_v32, %v1198_v2  ;;  %v1455_v15 = vrot.slane %v1394_v9, %v3958_v33  ;;  %v1438_v2 = vsel %vm1428_vm6, %v1437_v12, %v1433_v7 }
 0x1e1   : > { %v1393_v19 = vmul.f32 0.17677669, %v1377_v28  ;;  %v1442_v28 = vrot.slane %v1391_v41, %v3962_v62 }
 0x1e2   : > { %v1352_v18 = vpop.xlane.xlu0 %1351 }
 0x1e3   : > { %v1380_v50 = vadd.f32 %v1352_v18, %v1204_v26  ;;  %v1451_v22 = vrot.slane %v1393_v19, %v3962_v62  ;;  %v1447_v49 = vsel %vm1428_vm6, %v1446_v48, %v1442_v28 }
 0x1e5   : > { %v1396_v39 = vmul.f32 0.17677669, %v1380_v50 }
 0x1e6   : > { %v1349_v52 = vpop.xlane.xlu1 %1348 }
 0x1e7   : > { %v1379_v6 = vadd.f32 %v1349_v52, %v1202_v3 }
 0x1e9   : > { %v1395_v63 = vmul.f32 0.17677669, %v1379_v6 }
 0x1ea   : > { %v1358_v29 = vpop.xlane.xlu0 %1357 }
 0x1eb   : > { %v1382_v36 = vadd.f32 %v1358_v29, %v1208_v37  ;;  %v1460_v26 = vrot.slane %v1395_v63, %v3962_v62 }
 0x1ed   : > { %v1398_v59 = vmul.f32 0.17677669, %v1382_v36 }
 0x1ee   : > { %v1355_v14 = vpop.xlane.xlu1 %1354 }
 0x1ef   : > { %v1381_v21 = vadd.f32 %v1355_v14, %v1206_v23  ;;  %v1422_v14 = vrot.slane %v1387_v58, %v3962_v62  ;;  %v1473_v61 = vrot.slane %v1398_v59, %v3958_v33  ;;  %v4556_v59 = vmov 0.0  }
 0x1f1   : > { %v1397_v38 = vmul.f32 0.17677669, %v1381_v21 }
 0x1f2   : > { %v1364_v45 = vpop.xlane.xlu0 %1363 }
 0x1f3   : > { %v1384_v52 = vadd.f32 %v1364_v45, %v1212_v53  ;;  %v1469_v3 = vrot.slane %v1397_v38, %v3962_v62  ;;  %v1429_v53 = vsel %vm1428_vm6, %v1427_v24, %v1422_v14 }
 0x1f4   : > { %v1494_v58 = vsel %vm1493_vm7, %v1438_v2, %v1429_v53 }
 0x1f5   : > { %v1400_v37 = vmul.f32 0.17677669, %v1384_v52  ;;  %v1496_v50 = vsel %vm1495_vm8, %v1447_v49, %v1494_v58  ;;  %v1474_v45 = vsel %vm1428_vm6, %v1473_v61, %v1469_v3 }
 0x1f6   : > { %v1361_v60 = vpop.xlane.xlu1 %1360  ;;  %v1370_v43 = vpop.xlane.xlu0 %1369 }
 0x1f7   : > { %v1383_v6 = vadd.f32 %v1361_v60, %v1210_v51  ;;  %v1386_v29 = vadd.f32 %v1370_v43, %v1216_v4  ;;  %v1456_v51 = vsel %vm1428_vm6, %v1455_v15, %v1451_v22  ;;  %v1464_v4 = vrot.slane %v1396_v39, %v3958_v33 }
 0x1f8   : > { %v1482_v19 = vrot.slane %v1400_v37, %v3958_v33  ;;  %v1498_v36 = vsel %vm1497_vm11, %v1456_v51, %v1496_v50  ;;  %v1900_v22 = vcvt.f32.s32 %v3950_v16 }
 0x1f9   : > { %v1399_v23 = vmul.f32 0.17677669, %v1383_v6  ;;  %v1402_v18 = vmul.f32 0.17677669, %v1386_v29  ;;  %v1465_v41 = vsel %vm1428_vm6, %v1464_v4, %v1460_v26 }
 0x1fa   : > { %v1367_v31 = vpop.xlane.xlu1 %1366  ;;  %v1500_v63 = vsel %vm1499_vm12, %v1465_v41, %v1498_v36  ;;  %v1901_v60 = vshll.u32 %v1900_v22, 16 }
 0x1fb   : > { %v1478_v32 = vrot.slane %v1399_v23, %v3962_v62  ;;  %v1385_v21 = vadd.f32 %v1367_v31, %v3954_v8  ;;  %v1491_v8 = vrot.slane %v1402_v18, %v3958_v33  ;;  %v1502_v52 = vsel %vm1501_vm13, %v1474_v45, %v1500_v63 }
 0x1fd   : > { %v1401_v54 = vmul.f32 0.17677669, %v1385_v21  ;;  %v1483_v56 = vsel %vm1428_vm6, %v1482_v19, %v1478_v32 }
 0x1fe   : > { %v1504_v7 = vsel %vm1503_vm10, %v1483_v56, %v1502_v52 }
 0x1ff   : > { %v1487_v9 = vrot.slane %v1401_v54, %v3962_v62 }
 0x201   : > { %v1492_v24 = vsel %vm1428_vm6, %v1491_v8, %v1487_v9 }
 0x202   : > { %v1506_v38 = vsel %vm1505_vm3, %v1492_v24, %v1504_v7 }
 0x203   : > { %v1508_v14 = vsel %vm452_vm1, %v1506_v38, -1e+30 }
 0x204   : > { %v1509_v28 = vsel %vm720_vm2, %v1508_v14, -inf }
 0x205   : > { %1510 = vmax.xlane.f32.xlu0 %v1509_v28 }
 0x20d   : > { %v1898_v39 = vpop.xlane.xlu1 %1897 }
 0x20e   : > { %v1899_v43 = vcvt.f32.s32 %v1898_v39 }
 0x210   : > { %v1902_v12 = vadd.s32 %v1901_v60, %v1899_v43 }
 0x212   : > { %vm1903_vm14 = vcmp.eq.s32.totalorder %v3571_v47, %v1902_v12 }
 0x213   : > { %v2901_v6 = vsel %vm1903_vm14, 1.0, %v4556_v59 }
 0x214   : > { %v1909_v29 = vrot.slane %v2901_v6, %v3475_v11  ;;  %v1920_v48 = vrot.slane %v2901_v6, %v3472_v10  ;;  %v1931_v15 = vrot.slane %v2901_v6, %v3502_v20  ;;  %v1942_v16 = vrot.slane %v2901_v6, %v3514_v25 }
 0x215   : > { %v1953_v26 = vrot.slane %v2901_v6, %v3526_v30  ;;  %v1964_v37 = vrot.slane %v2901_v6, %v3538_v35  ;;  %v1975_v2 = vrot.slane %v2901_v6, %v3554_v40  ;;  %v1986_v3 = vrot.slane %v2901_v6, %v3560_v44 }
 0x216   : > { %1911 = vbcast.lane.b32.xlu1 %v1909_v29, 256 }
 0x21a   : > { %1922 = vbcast.lane.b32.xlu1 %v1920_v48, 256 }
 0x21b   : > { %1915 = vbcast.lane.b32.xlu0 %v1909_v29, 264 }
 0x21e   : > { %1926 = vbcast.lane.b32.xlu1 %v1920_v48, 264 }
 0x21f   : > { %1933 = vbcast.lane.b32.xlu0 %v1931_v15, 256 }
 0x222   : > { %1937 = vbcast.lane.b32.xlu1 %v1931_v15, 264 }
 0x223   : > { %1944 = vbcast.lane.b32.xlu0 %v1942_v16, 256 }
 0x226   : > { %1948 = vbcast.lane.b32.xlu1 %v1942_v16, 264 }
 0x227   : > { %1955 = vbcast.lane.b32.xlu0 %v1953_v26, 256 }
 0x22a   : > { %1959 = vbcast.lane.b32.xlu1 %v1953_v26, 264 }
 0x22b   : > { %1966 = vbcast.lane.b32.xlu0 %v1964_v37, 256 }
 0x22e   : > { %1970 = vbcast.lane.b32.xlu1 %v1964_v37, 264 }
 0x22f   : > { %1977 = vbcast.lane.b32.xlu0 %v1975_v2, 256 }
 0x232   : > { %1981 = vbcast.lane.b32.xlu1 %v1975_v2, 264 }
 0x233   : > { %1988 = vbcast.lane.b32.xlu0 %v1986_v3, 256 }
 0x236   : > { %1992 = vbcast.lane.b32.xlu1 %v1986_v3, 264 }
 0x288   : > { %v1912_v23 = vpop.permute.xlu1 %1911 }
 0x289   : > { %v1994_v58 = vmul.f32 %v3738_v46, %v1912_v23 }
 0x28c   : > { %v1923_v53 = vpop.permute.xlu1 %1922 }
 0x28d   : > { %v1996_v51 = vmul.f32 %v3746_v57, %v1923_v53 }
 0x290   : > { %v1927_v49 = vpop.permute.xlu1 %1926 }
 0x291   : > { %v1997_v4 = vmul.f32 %v3753_v0, %v1927_v49 }
 0x292   : > { %v1511_v31 = vpop.xlane.xlu0 %1510 }
 0x293   : > { %v2017_v61 = vadd.f32 %v1997_v4, %v1996_v51  ;;  %v1512_v50 = vsub.f32 %v1508_v14, %v1511_v31 }
 0x294   : > { %v1938_v32 = vpop.permute.xlu1 %1937 }
 0x295   : > { %v2018_v18 = vrot.slane %v2017_v61, 4  ;;  %v1999_v56 = vmul.f32 %v3762_v13, %v1938_v32  ;;  %v1513_v52 = vmul.f32 1.442695, %v1512_v50 }
 0x296   : > { %v1916_v21 = vpop.permute.xlu0 %1915 }
 0x297   : > { %v1995_v41 = vmul.f32 %v3743_v55, %v1916_v21  ;;  %v2019_v19 = vadd.f32 %v2018_v18, %v2017_v61  ;;  %3355 = vpow2.f32 %v1513_v52 }
 0x298   : > { %v1949_v45 = vpop.permute.xlu1 %1948 }
 0x299   : > { %v2010_v54 = vadd.f32 %v1995_v41, %v1994_v58  ;;  %v2020_v63 = vrot.slane %v2019_v19, 2  ;;  %v2001_v39 = vmul.f32 %v3771_v1, %v1949_v45  ;;  %v4557_v58 = vld [vmem:[#allocation3_spill] sm:$0xff] }
 0x29a   : > { %v1934_v36 = vpop.permute.xlu0 %1933 }
 0x29b   : > { %v2011_v8 = vrot.slane %v2010_v54, 4  ;;  %v1998_v9 = vmul.f32 %v3756_v5, %v1934_v36  ;;  %v2021_v43 = vadd.f32 %v2020_v63, %v2019_v19 }
 0x29c   : > { %v1960_v24 = vpop.permute.xlu1 %1959 }
 0x29d   : > { %v2012_v7 = vadd.f32 %v2011_v8, %v2010_v54  ;;  %v2024_v38 = vadd.f32 %v1999_v56, %v1998_v9  ;;  %v2003_v15 = vmul.f32 %v3787_v34, %v1960_v24  ;;  %v2022_v23 = vrot.slane %v2021_v43, 1  ;;  %v4558_v24 = vld [vmem:[#allocation7_spill] sm:$0xff] }
 0x29e   : > { %v1945_v28 = vpop.permute.xlu0 %1944 }
 0x29f   : > { %v2013_v22 = vrot.slane %v2012_v7, 2  ;;  %v2025_v60 = vrot.slane %v2024_v38, 4  ;;  %v2000_v14 = vmul.f32 %v3765_v17, %v1945_v28  ;;  %v2023_v45 = vadd.f32 %v2022_v23, %v2021_v43  ;;  %v4559_v28 = vld [vmem:[#allocation5_spill] sm:$0xff] }
 0x2a0   : > { %v1971_v12 = vpop.permute.xlu1 %1970 }
 0x2a1   : > { %v2014_v6 = vadd.f32 %v2013_v22, %v2012_v7  ;;  %v2026_v29 = vadd.f32 %v2025_v60, %v2024_v38  ;;  %v2031_v48 = vadd.f32 %v2001_v39, %v2000_v14  ;;  %v2005_v18 = vmul.f32 %v3798_v42, %v1971_v12  ;;  %v4024_v9 = vpop.eup %3355 }
 0x2a2   : > { %v1956_v16 = vpop.permute.xlu0 %1955  ;;  %v2069_v60 = vmul.f32 %v3753_v0, %v2023_v45 }
 0x2a3   : > { %v2027_v26 = vrot.slane %v2026_v29, 2  ;;  %v2032_v37 = vrot.slane %v2031_v48, 4  ;;  %v2002_v2 = vmul.f32 %v3774_v27, %v1956_v16  ;;  %v2015_v3 = vrot.slane %v2014_v6, 1 }
 0x2a4   : > { %v1982_v4 = vpop.permute.xlu1 %1981 }
 0x2a5   : > { %v2028_v53 = vadd.f32 %v2027_v26, %v2026_v29  ;;  %v2033_v49 = vadd.f32 %v2032_v37, %v2031_v48  ;;  %v2038_v51 = vadd.f32 %v2003_v15, %v2002_v2  ;;  %v2016_v61 = vadd.f32 %v2015_v3, %v2014_v6  ;;  %v4560_v26 = vld [vmem:[#allocation8_spill] sm:$0xff]  ;;  %v4561_v3 = vld [vmem:[#allocation6_spill] sm:$0xff] }
 0x2a6   : > { %v1967_v31 = vpop.permute.xlu0 %1966  ;;  %v2007_v7 = vmul.f32 %v4558_v24, %v1982_v4  ;;  %v1515_v48 = vsel %vm720_vm2, %v4024_v9, 0.0 }
 0x2a7   : > { %v2034_v32 = vrot.slane %v2033_v49, 2  ;;  %v2039_v21 = vrot.slane %v2038_v51, 4  ;;  %v2004_v41 = vmul.f32 %v4557_v58, %v1967_v31  ;;  %v2067_v19 = vmul.f32 %v3743_v55, %v2016_v61 }
 0x2a8   : > { %v2066_v50 = vmul.f32 %v3738_v46, %v2016_v61  ;;  %v2029_v54 = vrot.slane %v2028_v53, 1  ;;  %v1993_v39 = vpop.permute.xlu1 %1992 }
 0x2a9   : > { %v2035_v36 = vadd.f32 %v2034_v32, %v2033_v49  ;;  %v2040_v56 = vadd.f32 %v2039_v21, %v2038_v51  ;;  %v2045_v8 = vadd.f32 %v2005_v18, %v2004_v41  ;;  %2084 = vadd.xlane.f32.xlu0 %v2067_v19  ;;  %v2009_v37 = vmul.f32 %v4560_v26, %v1993_v39 }
 0x2aa   : > { %2082 = vadd.xlane.f32.xlu1 %v2066_v50  ;;  %v1978_v63 = vpop.permute.xlu0 %1977  ;;  %v2030_v14 = vadd.f32 %v2029_v54, %v2028_v53  ;;  %v2068_v49 = vmul.f32 %v3746_v57, %v2023_v45 }
 0x2ab   : > { %v2041_v52 = vrot.slane %v2040_v56, 2  ;;  %v2046_v38 = vrot.slane %v2045_v8, 4  ;;  %v2006_v22 = vmul.f32 %v4559_v28, %v1978_v63  ;;  %v2036_v43 = vrot.slane %v2035_v36, 1 }
 0x2ac   : > { %v2071_v53 = vmul.f32 %v3762_v13, %v2030_v14  ;;  %v2070_v41 = vmul.f32 %v3756_v5, %v2030_v14 }
 0x2ad   : > { %v2042_v12 = vadd.f32 %v2041_v52, %v2040_v56  ;;  %v2047_v6 = vadd.f32 %v2046_v38, %v2045_v8  ;;  %v2052_v29 = vadd.f32 %v2007_v7, %v2006_v22  ;;  %1516 = vadd.xlane.f32.xlu0 %v1515_v48  ;;  %v2037_v51 = vadd.f32 %v2036_v43, %v2035_v36 }
 0x2ae   : > { %2088 = vadd.xlane.f32.xlu1 %v2069_v60  ;;  %v1989_v15 = vpop.permute.xlu0 %1988 }
 0x2af   : > { %v2048_v16 = vrot.slane %v2047_v6, 2  ;;  %v2053_v2 = vrot.slane %v2052_v29, 4  ;;  %v2008_v23 = vmul.f32 %v4561_v3, %v1989_v15  ;;  %v2043_v4 = vrot.slane %v2042_v12, 1 }
 0x2b0   : > { %v2073_v19 = vmul.f32 %v3771_v1, %v2037_v51  ;;  %v2072_v36 = vmul.f32 %v3765_v17, %v2037_v51 }
 0x2b1   : > { %v2049_v31 = vadd.f32 %v2048_v16, %v2047_v6  ;;  %v2054_v61 = vadd.f32 %v2053_v2, %v2052_v29  ;;  %v2059_v32 = vadd.f32 %v2009_v37, %v2008_v23  ;;  %2086 = vadd.xlane.f32.xlu0 %v2068_v49  ;;  %v2044_v50 = vadd.f32 %v2043_v4, %v2042_v12 }
 0x2b2   : > { %2092 = vadd.xlane.f32.xlu1 %v2071_v53 }
 0x2b3   : > { %v2055_v18 = vrot.slane %v2054_v61, 2  ;;  %v2060_v21 = vrot.slane %v2059_v32, 4  ;;  %v2050_v54 = vrot.slane %v2049_v31, 1  ;;  %v2075_v63 = vmul.f32 %v3787_v34, %v2044_v50 }
 0x2b4   : > { %v2074_v22 = vmul.f32 %v3774_v27, %v2044_v50 }
 0x2b5   : > { %v2056_v56 = vadd.f32 %v2055_v18, %v2054_v61  ;;  %v2061_v8 = vadd.f32 %v2060_v21, %v2059_v32  ;;  %2090 = vadd.xlane.f32.xlu0 %v2070_v41  ;;  %v2051_v52 = vadd.f32 %v2050_v54, %v2049_v31 }
 0x2b6   : > { %2096 = vadd.xlane.f32.xlu1 %v2073_v19 }
 0x2b7   : > { %v2062_v45 = vrot.slane %v2061_v8, 2  ;;  %v2057_v7 = vrot.slane %v2056_v56, 1  ;;  %v2077_v39 = vmul.f32 %v3798_v42, %v2051_v52  ;;  %v2076_v43 = vmul.f32 %v4557_v58, %v2051_v52  ;;  %v1768_v52 = vld [vmem:[%s4484_s5] sm:$0xff] }
 0x2b9   : > { %v2063_v38 = vadd.f32 %v2062_v45, %v2061_v8  ;;  %2094 = vadd.xlane.f32.xlu0 %v2072_v36  ;;  %v2058_v60 = vadd.f32 %v2057_v7, %v2056_v56  ;;  %v1769_v7 = vld [vmem:[%s4484_s5 + $0x8] sm:$0xff] }
 0x2ba   : > { %2100 = vadd.xlane.f32.xlu1 %v2075_v63 }
 0x2bb   : > { %v2064_v14 = vrot.slane %v2063_v38, 1  ;;  %v2079_v12 = vmul.f32 %v4558_v24, %v2058_v60  ;;  %v2078_v29 = vmul.f32 %v4559_v28, %v2058_v60 }
 0x2bd   : > { %2098 = vadd.xlane.f32.xlu0 %v2074_v22  ;;  %v2065_v6 = vadd.f32 %v2064_v14, %v2063_v38  ;;  %v3239_v38 = vpack.c.bf16 %v1769_v7, %v1768_v52 }
 0x2be   : > { %2104 = vadd.xlane.f32.xlu1 %v2077_v39  ;;  %v4562_v39 = vmov 0.0|0.0  }
 0x2bf   : > { %v2081_v48 = vmul.f32 %v4560_v26, %v2065_v6  ;;  %v2080_v15 = vmul.f32 %v4561_v3, %v2065_v6  ;;  %3240 = vmatpush3.bf16.msra.mxu1 %v3239_v38 }
 0x2c0   : > { %3241 = vmatprep.subr.bf16.mxu1 %v4562_v39 }
 0x2c1   : > { %2102 = vadd.xlane.f32.xlu0 %v2076_v43 }
 0x2c2   : > { %2108 = vadd.xlane.f32.xlu1 %v2079_v12 }
 0x2c5   : > { %2106 = vadd.xlane.f32.xlu0 %v2078_v29 }
 0x2c6   : > { %2112 = vadd.xlane.f32.xlu1 %v2081_v48 }
 0x2c9   : > { %2110 = vadd.xlane.f32.xlu0 %v2080_v15 }
 0x336   : > { %v2085_v16 = vpop.xlane.xlu0 %2084 }
 0x337   : > { %v2083_v51 = vpop.xlane.xlu1 %2082  ;;  %v2115_v12 = vmul.f32 0.17677669, %v2085_v16 }
 0x338   : > { %v2114_v14 = vmul.f32 0.17677669, %v2083_v51 }
 0x33a   : > { %v1517_v37 = vpop.xlane.xlu0 %1516 }
 0x33b   : > { %3357 = vrcp.f32 %v1517_v37  ;;  %v2089_v61 = vpop.xlane.xlu1 %2088 }
 0x33c   : > { %v2117_v29 = vmul.f32 0.17677669, %v2089_v61 }
 0x33e   : > { %v2087_v31 = vpop.xlane.xlu0 %2086  ;;  %v2162_v16 = vrot.slane %v2117_v29, %v3958_v33 }
 0x33f   : > { %v2093_v21 = vpop.xlane.xlu1 %2092  ;;  %v2116_v43 = vmul.f32 0.17677669, %v2087_v31 }
 0x340   : > { %v2119_v15 = vmul.f32 0.17677669, %v2093_v21 }
 0x343   : > { %v2097_v50 = vpop.xlane.xlu1 %2096 }
 0x345   : > { %v3358_v2 = vpop.eup %3357 }
 0x346   : > { %v1519_v23 = vmul.f32 %v3358_v2, %v4024_v9  ;;  %v2091_v9 = vpop.xlane.xlu0 %2090 }
 0x347   : > { %v2101_v45 = vpop.xlane.xlu1 %2100  ;;  %v2118_v6 = vmul.f32 0.17677669, %v2091_v9 }
 0x348   : > { %v1523_v49 = vrot.slane %v1519_v23, %v3475_v11  ;;  %v1534_v53 = vrot.slane %v1519_v23, %v3472_v10  ;;  %v1545_v4 = vrot.slane %v1519_v23, %v3502_v20  ;;  %v1556_v32 = vrot.slane %v1519_v23, %v3514_v25 }
 0x349   : > { %v1567_v18 = vrot.slane %v1519_v23, %v3526_v30  ;;  %v1578_v41 = vrot.slane %v1519_v23, %v3538_v35  ;;  %v1589_v54 = vrot.slane %v1519_v23, %v3554_v40  ;;  %v1600_v8 = vrot.slane %v1519_v23, %v3560_v44 }
 0x34a   : > { %1529 = vbcast.lane.b32.xlu1 %v1523_v49, 264  ;;  %1525 = vbcast.lane.b32.xlu0 %v1523_v49, 256  ;;  %v2095_v19 = vpop.xlane.xlu0 %2094  ;;  %v2149_v23 = vrot.slane %v2114_v14, %v3962_v62  ;;  %v2158_v49 = vrot.slane %v2116_v43, %v3962_v62 }
 0x34b   : > { %v2105_v63 = vpop.xlane.xlu1 %2104  ;;  %v2120_v48 = vmul.f32 0.17677669, %v2095_v19  ;;  %v2171_v19 = vrot.slane %v2119_v15, %v3958_v33 }
 0x34c   : > { %v2125_v9 = vmul.f32 0.17677669, %v2105_v63 }
 0x34d   : > { %v2176_v61 = vrot.slane %v2120_v48, %v3962_v62 }
 0x34e   : > { %1536 = vbcast.lane.b32.xlu1 %v1534_v53, 256  ;;  %1540 = vbcast.lane.b32.xlu0 %v1534_v53, 264  ;;  %v2099_v56 = vpop.xlane.xlu0 %2098  ;;  %v2121_v53 = vmul.f32 0.17677669, %v2097_v50  ;;  %v2163_v50 = vsel %vm1428_vm6, %v2162_v16, %v2158_v49  ;;  %v2198_v14 = vrot.slane %v2125_v9, %v3958_v33 }
 0x34f   : > { %v2109_v60 = vpop.xlane.xlu1 %2108  ;;  %v2122_v37 = vmul.f32 0.17677669, %v2099_v56 }
 0x350   : > { %v2127_v56 = vmul.f32 0.17677669, %v2109_v60 }
 0x352   : > { %1547 = vbcast.lane.b32.xlu1 %v1545_v4, 256  ;;  %1551 = vbcast.lane.b32.xlu0 %v1545_v4, 264  ;;  %v2103_v36 = vpop.xlane.xlu0 %2102 }
 0x353   : > { %v2124_v4 = vmul.f32 0.17677669, %v2103_v36  ;;  %v2113_v51 = vpop.xlane.xlu1 %2112 }
 0x355   : > { %v2194_v36 = vrot.slane %v2124_v4, %v3962_v62 }
 0x356   : > { %1558 = vbcast.lane.b32.xlu1 %v1556_v32, 256  ;;  %1562 = vbcast.lane.b32.xlu0 %v1556_v32, 264  ;;  %v2107_v22 = vpop.xlane.xlu0 %2106  ;;  %v2153_v32 = vrot.slane %v2115_v12, %v3958_v33 }
 0x357   : > { %v2126_v31 = vmul.f32 0.17677669, %v2107_v22  ;;  %v2199_v48 = vsel %vm1428_vm6, %v2198_v14, %v2194_v36  ;;  %v4563_v36 = vld [vmem:[#allocation9_spill] sm:$0xff] }
 0x358   : > { %v2154_v63 = vsel %vm1428_vm6, %v2153_v32, %v2149_v23 }
 0x359   : > { %v2203_v38 = vrot.slane %v2126_v31, %v3962_v62  ;;  %v2218_v43 = vsel %vm1493_vm7, %v2163_v50, %v2154_v63 }
 0x35a   : > { %1569 = vbcast.lane.b32.xlu1 %v1567_v18, 256  ;;  %1573 = vbcast.lane.b32.xlu0 %v1567_v18, 264  ;;  %v2111_v2 = vpop.xlane.xlu0 %2110  ;;  %v2167_v18 = vrot.slane %v2118_v6, %v3962_v62  ;;  %v2207_v6 = vrot.slane %v2127_v56, %v3958_v33 }
 0x35b   : > { %v2128_v21 = vmul.f32 0.17677669, %v2111_v2 }
 0x35c   : > { %v2172_v52 = vsel %vm1428_vm6, %v2171_v19, %v2167_v18  ;;  %v2208_v2 = vsel %vm1428_vm6, %v2207_v6, %v2203_v38  ;;  %v4565_v38 = vld [vmem:[#allocation12_spill] sm:$0xff] }
 0x35d   : > { %v2212_v60 = vrot.slane %v2128_v21, %v3962_v62  ;;  %v2219_v29 = vsel %vm1495_vm8, %v2172_v52, %v2218_v43  ;;  %v4564_v52 = vld [vmem:[#allocation10_spill] sm:$0xff] }
 0x35e   : > { %1580 = vbcast.lane.b32.xlu1 %v1578_v41, 256  ;;  %1584 = vbcast.lane.b32.xlu0 %v1578_v41, 264  ;;  %v2123_v41 = vmul.f32 0.17677669, %v2101_v45  ;;  %v2129_v45 = vmul.f32 0.17677669, %v2113_v51 }
 0x360   : > { %v2189_v7 = vrot.slane %v2123_v41, %v3958_v33  ;;  %v2216_v15 = vrot.slane %v2129_v45, %v3958_v33 }
 0x362   : > { %1591 = vbcast.lane.b32.xlu1 %v1589_v54, 256  ;;  %1595 = vbcast.lane.b32.xlu0 %v1589_v54, 264  ;;  %v2185_v54 = vrot.slane %v2122_v37, %v3962_v62  ;;  %v2217_v62 = vsel %vm1428_vm6, %v2216_v15, %v2212_v60 }
 0x364   : > { %v2190_v12 = vsel %vm1428_vm6, %v2189_v7, %v2185_v54 }
 0x366   : > { %1602 = vbcast.lane.b32.xlu1 %v1600_v8, 256  ;;  %1606 = vbcast.lane.b32.xlu0 %v1600_v8, 264  ;;  %v2180_v8 = vrot.slane %v2121_v53, %v3958_v33 }
 0x368   : > { %v2181_v22 = vsel %vm1428_vm6, %v2180_v8, %v2176_v61 }
 0x369   : > { %v2220_v37 = vsel %vm1497_vm11, %v2181_v22, %v2219_v29  ;;  %v4566_v22 = vld [vmem:[#allocation11_spill] sm:$0xff]  ;;  %v4568_v29 = vld [vmem:[#allocation13_spill] sm:$0xff] }
 0x36a   : > { %v2221_v23 = vsel %vm1499_vm12, %v2190_v12, %v2220_v37  ;;  %v4567_v12 = vld [vmem:[#allocation14_spill] sm:$0xff]  ;;  %v4569_v37 = vld [vmem:[#allocation16_spill] sm:$0xff] }
 0x36b   : > { %v2222_v49 = vsel %vm1501_vm13, %v2199_v48, %v2221_v23 }
 0x36c   : > { %v2223_v53 = vsel %vm1503_vm10, %v2208_v2, %v2222_v49 }
 0x36d   : > { %v2224_v4 = vsel %vm1505_vm3, %v2217_v62, %v2223_v53  ;;  %v4570_v62 = vld [vmem:[#allocation15_spill] sm:$0xff] }
 0x36e   : > { %v4095_v32 = vsel %vm452_vm1, %v2224_v4, -1e+30 }
 0x36f   : > { %v2227_v33 = vsel %vm720_vm2, %v4095_v32, -inf }
 0x38a   : > { %2228 = vmax.xlane.f32.xlu1 %v2227_v33 }
 0x3bc   : > { %v1530_v18 = vpop.permute.xlu1 %1529  ;;  %v1526_v41 = vpop.permute.xlu0 %1525 }
 0x3bd   : > { %v1697_v51 = vmul.f32 %v3743_v55, %v1530_v18  ;;  %v1696_v31 = vmul.f32 %v3738_v46, %v1526_v41  ;;  %v1609_v45 = vmul.f32 %v4563_v36, %v1530_v18  ;;  %v1608_v7 = vmul.f32 %v4564_v52, %v1526_v41 }
 0x3bf   : > { %v4101_v16 = vadd.f32 %v1697_v51, %v1696_v31  ;;  %v1625_v53 = vsel %vm720_vm2, %v1609_v45, 0.0  ;;  %v1624_v4 = vsel %vm720_vm2, %v1608_v7, 0.0 }
 0x3c0   : > { %v1537_v61 = vpop.permute.xlu1 %1536  ;;  %v1541_v9 = vpop.permute.xlu0 %1540  ;;  %v1626_v45 = vadd.f32 %v1625_v53, %v1624_v4 }
 0x3c1   : > { %v1698_v21 = vmul.f32 %v3746_v57, %v1537_v61  ;;  %v1699_v47 = vmul.f32 %v3753_v0, %v1541_v9  ;;  %v1610_v63 = vmul.f32 %v4565_v38, %v1537_v61  ;;  %v1611_v14 = vmul.f32 %v4566_v22, %v1541_v9  ;;  %v4572_v22 = vld [vmem:[#allocation17_spill] sm:$0xff] }
 0x3c3   : > { %v4105_v19 = vadd.f32 %v1699_v47, %v1698_v21  ;;  %v1633_v33 = vsel %vm720_vm2, %v1610_v63, 0.0  ;;  %v1634_v18 = vsel %vm720_vm2, %v1611_v14, 0.0  ;;  %v4571_v21 = vld [vmem:[#allocation18_spill] sm:$0xff] }
 0x3c4   : > { %v1548_v54 = vpop.permute.xlu1 %1547  ;;  %v1552_v56 = vpop.permute.xlu0 %1551 }
 0x3c5   : > { %v1700_v50 = vmul.f32 %v3756_v5, %v1548_v54  ;;  %v1701_v8 = vmul.f32 %v3762_v13, %v1552_v56  ;;  %v1612_v6 = vmul.f32 %v4567_v12, %v1548_v54  ;;  %v1613_v48 = vmul.f32 %v4568_v29, %v1552_v56  ;;  %v4573_v12 = vld [vmem:[#allocation20_spill] sm:$0xff] }
 0x3c7   : > { %v4115_v15 = vadd.f32 %v1701_v8, %v1700_v50  ;;  %v1642_v31 = vsel %vm720_vm2, %v1612_v6, 0.0  ;;  %v1643_v61 = vsel %vm720_vm2, %v1613_v48, 0.0  ;;  %v1635_v50 = vadd.f32 %v1634_v18, %v1633_v33 }
 0x3c8   : > { %v1559_v60 = vpop.permute.xlu1 %1558  ;;  %v1563_v43 = vpop.permute.xlu0 %1562  ;;  %v1644_v52 = vadd.f32 %v1643_v61, %v1642_v31 }
 0x3c9   : > { %v1614_v2 = vmul.f32 %v4569_v37, %v1559_v60  ;;  %v1702_v23 = vmul.f32 %v3765_v17, %v1559_v60  ;;  %v1615_v49 = vmul.f32 %v4570_v62, %v1563_v43  ;;  %v1703_v9 = vmul.f32 %v3771_v1, %v1563_v43 }
 0x3ca   : > { %v1636_v29 = vrot.slane %v1635_v50, 4 }
 0x3cb   : > { %v1651_v54 = vsel %vm720_vm2, %v1614_v2, 0.0  ;;  %v1652_v56 = vsel %vm720_vm2, %v1615_v49, 0.0  ;;  %v4130_v8 = vadd.f32 %v1703_v9, %v1702_v23  ;;  %v1627_v2 = vrot.slane %v1626_v45, 4  ;;  %v4575_v9 = vld [vmem:[#allocation22_spill] sm:$0xff] }
 0x3cc   : > { %v1570_v41 = vpop.permute.xlu1 %1569  ;;  %v1574_v51 = vpop.permute.xlu0 %1573  ;;  %v1653_v38 = vadd.f32 %v1652_v56, %v1651_v54  ;;  %v1645_v23 = vrot.slane %v1644_v52, 4  ;;  %v1637_v61 = vadd.f32 %v1636_v29, %v1635_v50 }
 0x3cd   : > { %v1616_v47 = vmul.f32 %v4571_v21, %v1570_v41  ;;  %v1704_v36 = vmul.f32 %v3774_v27, %v1570_v41  ;;  %v1617_v14 = vmul.f32 %v4572_v22, %v1574_v51  ;;  %v1705_v60 = vmul.f32 %v3787_v34, %v1574_v51  ;;  %v4574_v41 = vld [vmem:[#allocation19_spill] sm:$0xff] }
 0x3ce   : > { %v1654_v53 = vrot.slane %v1653_v38, 4  ;;  %v1628_v54 = vadd.f32 %v1627_v2, %v1626_v45  ;;  %v1646_v56 = vadd.f32 %v1645_v23, %v1644_v52  ;;  %v1638_v29 = vrot.slane %v1637_v61, 2 }
 0x3cf   : > { %v1660_v63 = vsel %vm720_vm2, %v1616_v47, 0.0  ;;  %v1661_v48 = vsel %vm720_vm2, %v1617_v14, 0.0  ;;  %v4138_v37 = vadd.f32 %v1705_v60, %v1704_v36 }
 0x3d0   : > { %v1581_v7 = vpop.permute.xlu1 %1580  ;;  %v1585_v43 = vpop.permute.xlu0 %1584  ;;  %v1662_v62 = vadd.f32 %v1661_v48, %v1660_v63  ;;  %v1655_v22 = vadd.f32 %v1654_v53, %v1653_v38  ;;  %v1629_v52 = vrot.slane %v1628_v54, 2  ;;  %v1647_v2 = vrot.slane %v1646_v56, 2  ;;  %v4577_v38 = vld [vmem:[#allocation24_spill] sm:$0xff] }
 0x3d1   : > { %v1618_v6 = vmul.f32 %v4573_v12, %v1581_v7  ;;  %v1706_v4 = vmul.f32 %v4557_v58, %v1581_v7  ;;  %v1619_v51 = vmul.f32 %v4574_v41, %v1585_v43  ;;  %v1707_v31 = vmul.f32 %v3798_v42, %v1585_v43  ;;  %v4576_v43 = vld [vmem:[#allocation21_spill] sm:$0xff] }
 0x3d2   : > { %v1663_v33 = vrot.slane %v1662_v62, 4 }
 0x3d3   : > { %v1669_v18 = vsel %vm720_vm2, %v1618_v6, 0.0  ;;  %v1670_v36 = vsel %vm720_vm2, %v1619_v51, 0.0  ;;  %v4146_v63 = vadd.f32 %v1707_v31, %v1706_v4  ;;  %v1656_v4 = vrot.slane %v1655_v22, 2 }
 0x3d4   : > { %v1592_v49 = vpop.permute.xlu1 %1591  ;;  %v1596_v47 = vpop.permute.xlu0 %1595  ;;  %v1671_v14 = vadd.f32 %v1670_v36, %v1669_v18  ;;  %v1664_v12 = vadd.f32 %v1663_v33, %v1662_v62  ;;  %v1639_v51 = vadd.f32 %v1638_v29, %v1637_v61  ;;  %v4578_v36 = vld [vmem:[#allocation23_spill] sm:$0xff] }
 0x3d5   : > { %v1620_v21 = vmul.f32 %v4575_v9, %v1592_v49  ;;  %v1708_v7 = vmul.f32 %v4559_v28, %v1592_v49  ;;  %v1621_v50 = vmul.f32 %v4576_v43, %v1596_v47  ;;  %v1709_v45 = vmul.f32 %v4558_v24, %v1596_v47 }
 0x3d6   : > { %v1672_v48 = vrot.slane %v1671_v14, 4  ;;  %v1665_v33 = vrot.slane %v1664_v12, 2  ;;  %v1630_v24 = vadd.f32 %v1629_v52, %v1628_v54 }
 0x3d7   : > { %v1678_v6 = vsel %vm720_vm2, %v1620_v21, 0.0  ;;  %v1679_v23 = vsel %vm720_vm2, %v1621_v50, 0.0  ;;  %v4157_v41 = vadd.f32 %v1709_v45, %v1708_v7  ;;  %v1648_v21 = vadd.f32 %v1647_v2, %v1646_v56 }
 0x3d8   : > { %v4149_v60 = vpop.permute.xlu1 %1602  ;;  %v1673_v49 = vadd.f32 %v1672_v48, %v1671_v14  ;;  %v1680_v18 = vadd.f32 %v1679_v23, %v1678_v6  ;;  %v1607_v62 = vpop.permute.xlu0 %1606  ;;  %v1657_v50 = vadd.f32 %v1656_v4, %v1655_v22  ;;  %v1666_v42 = vadd.f32 %v1665_v33, %v1664_v12 }
 0x3d9   : > { %v1622_v53 = vmul.f32 %v4577_v38, %v4149_v60  ;;  %v1623_v43 = vmul.f32 %v4578_v36, %v1607_v62  ;;  %v1640_v14 = vrot.slane %v1639_v51, 1  ;;  %v1649_v45 = vrot.slane %v1648_v21, 1 }
 0x3da   : > { %v1674_v31 = vrot.slane %v1673_v49, 2  ;;  %v1681_v9 = vrot.slane %v1680_v18, 4  ;;  %v1631_v23 = vrot.slane %v1630_v24, 1  ;;  %v1658_v61 = vrot.slane %v1657_v50, 1 }
 0x3db   : > { %v1687_v47 = vsel %vm720_vm2, %v1622_v53, 0.0  ;;  %v1688_v38 = vsel %vm720_vm2, %v1623_v43, 0.0  ;;  %v1667_v56 = vrot.slane %v1666_v42, 1  ;;  %v1641_v2 = vadd.f32 %v1640_v14, %v1639_v51 }
 0x3dc   : > { %v1682_v28 = vadd.f32 %v1681_v9, %v1680_v18  ;;  %v1675_v6 = vadd.f32 %v1674_v31, %v1673_v49  ;;  %v1689_v48 = vadd.f32 %v1688_v38, %v1687_v47  ;;  %v1650_v36 = vadd.f32 %v1649_v45, %v1648_v21 }
 0x3dd   : > { %v1632_v22 = vadd.f32 %v1631_v23, %v1630_v24  ;;  %v1659_v52 = vadd.f32 %v1658_v61, %v1657_v50  ;;  %v1668_v4 = vadd.f32 %v1667_v56, %v1666_v42  ;;  %v1720_v45 = vrot.slane %v4105_v19, 4 }
 0x3de   : > { %v1683_v7 = vrot.slane %v1682_v28, 2  ;;  %v1690_v58 = vrot.slane %v1689_v48, 4  ;;  %v1676_v53 = vrot.slane %v1675_v6, 1  ;;  %v1727_v23 = vrot.slane %v4115_v15, 4 }
 0x3df   : > { %v1778_v18 = vsel %vm1493_vm7, %v1641_v2, %v1632_v22  ;;  %v1734_v61 = vrot.slane %v4130_v8, 4  ;;  %v1748_v56 = vrot.slane %v4146_v63, 4  ;;  %v1755_v2 = vrot.slane %v4157_v41, 4 }
 0x3e0   : > { %v1684_v29 = vadd.f32 %v1683_v7, %v1682_v28  ;;  %v1691_v34 = vadd.f32 %v1690_v58, %v1689_v48  ;;  %v1677_v49 = vadd.f32 %v1676_v53, %v1675_v6  ;;  %v1779_v9 = vsel %vm1495_vm8, %v1650_v36, %v1778_v18 }
 0x3e1   : > { %v1780_v28 = vsel %vm1497_vm11, %v1659_v52, %v1779_v9  ;;  %v1710_v6 = vmul.f32 %v4561_v3, %v4149_v60  ;;  %v1711_v7 = vmul.f32 %v4560_v26, %v1607_v62  ;;  %v1713_v48 = vrot.slane %v4101_v16, 4 }
 0x3e2   : > { %v1685_v54 = vrot.slane %v1684_v29, 1  ;;  %v1692_v12 = vrot.slane %v1691_v34, 2  ;;  %v1781_v51 = vsel %vm1499_vm12, %v1668_v4, %v1780_v28  ;;  %v1721_v60 = vadd.f32 %v1720_v45, %v4105_v19 }
 0x3e3   : > { %v1782_v58 = vsel %vm1501_vm13, %v1677_v49, %v1781_v51  ;;  %v1714_v53 = vadd.f32 %v1713_v48, %v4101_v16  ;;  %v1728_v62 = vadd.f32 %v1727_v23, %v4115_v15  ;;  %v1735_v36 = vadd.f32 %v1734_v61, %v4130_v8 }
 0x3e4   : > { %v1693_v33 = vadd.f32 %v1692_v12, %v1691_v34  ;;  %v1686_v31 = vadd.f32 %v1685_v54, %v1684_v29  ;;  %v1761_v29 = vadd.f32 %v1711_v7, %v1710_v6  ;;  %v1749_v52 = vadd.f32 %v1748_v56, %v4146_v63 }
 0x3e5   : > { %v1756_v12 = vadd.f32 %v1755_v2, %v4157_v41  ;;  %v1715_v18 = vrot.slane %v1714_v53, 2  ;;  %v1722_v49 = vrot.slane %v1721_v60, 2 }
 0x3e6   : > { %v1694_v47 = vrot.slane %v1693_v33, 1  ;;  %v1783_v24 = vsel %vm1503_vm10, %v1686_v31, %v1782_v58  ;;  %v1762_v22 = vrot.slane %v1761_v29, 4  ;;  %v1736_v31 = vrot.slane %v1735_v36, 2 }
 0x3e7   : > { %v1750_v19 = vrot.slane %v1749_v52, 2  ;;  %v1716_v15 = vadd.f32 %v1715_v18, %v1714_v53  ;;  %v1723_v28 = vadd.f32 %v1722_v49, %v1721_v60 }
 0x3e8   : > { %v1695_v43 = vadd.f32 %v1694_v47, %v1693_v33  ;;  %v1729_v33 = vrot.slane %v1728_v62, 2  ;;  %v1763_v9 = vadd.f32 %v1762_v22, %v1761_v29  ;;  %v1757_v47 = vrot.slane %v1756_v12, 2 }
 0x3e9   : > { %v1737_v51 = vadd.f32 %v1736_v31, %v1735_v36  ;;  %v1751_v58 = vadd.f32 %v1750_v19, %v1749_v52  ;;  %v1724_v41 = vrot.slane %v1723_v28, 1 }
 0x3ea   : > { %v1784_v21 = vsel %vm1505_vm3, %v1695_v43, %v1783_v24  ;;  %v1730_v8 = vadd.f32 %v1729_v33, %v1728_v62  ;;  %v1764_v43 = vrot.slane %v1763_v9, 2  ;;  %v1758_v63 = vadd.f32 %v1757_v47, %v1756_v12 }
 0x3eb   : > { %3072 = vmatmul.mubr.msk.f32.vlgmr.msra.gmra.mrb[0].mxu1 %vm720_vm2, %v1784_v21  ;;  %v1717_v24 = vrot.slane %v1716_v15, 1  ;;  %v1752_v6 = vrot.slane %v1751_v58, 1  ;;  %v1725_v23 = vadd.f32 %v1724_v41, %v1723_v28 }
 0x3ec   : > { %3106 = vmatprep.mubr.msk.f32.mxu1 %vm3374_vm0, %v4556_v59  ;;  %v1759_v7 = vrot.slane %v1758_v63, 1 }
 0x3ed   : > { %v1718_v45 = vadd.f32 %v1717_v24, %v1716_v15  ;;  %v1753_v53 = vadd.f32 %v1752_v6, %v1751_v58  ;;  %v2414_v58 = vld [vmem:[%s4486_s7] sm:$0xff] }
 0x3ee   : > { %v1760_v60 = vadd.f32 %v1759_v7, %v1758_v63  ;;  %v2415_v63 = vld [vmem:[%s4486_s7 + $0x8] sm:$0xff] }
 0x417   : > { %v2229_v34 = vpop.xlane.xlu1 %2228 }
 0x418   : > { %v2230_v42 = vsub.f32 %v4095_v32, %v2229_v34  ;;  %v1741_v32 = vrot.slane %v4138_v37, 4  ;;  %v1731_v34 = vrot.slane %v1730_v8, 1 }
 0x41a   : > { %v2231_v50 = vmul.f32 1.442695, %v2230_v42  ;;  %v1742_v54 = vadd.f32 %v1741_v32, %v4138_v37  ;;  %v1738_v42 = vrot.slane %v1737_v51, 1  ;;  %v1732_v32 = vadd.f32 %v1731_v34, %v1730_v8 }
 0x41c   : > { %3359 = vpow2.f32 %v2231_v50  ;;  %v1743_v16 = vrot.slane %v1742_v54, 2  ;;  %v1739_v29 = vadd.f32 %v1738_v42, %v1737_v51 }
 0x41e   : > { %v1744_v37 = vadd.f32 %v1743_v16, %v1742_v54 }
 0x420   : > { %v1745_v50 = vrot.slane %v1744_v37, 1 }
 0x422   : > { %v1746_v56 = vadd.f32 %v1745_v50, %v1744_v37 }
 0x426   : > { %v3360_v38 = vpop.eup %3359 }
 0x427   : > { %v2233_v14 = vsel %vm720_vm2, %v3360_v38, 0.0 }
 0x428   : > { %2234 = vadd.xlane.f32.xlu0 %v2233_v14  ;;  %v1765_v14 = vadd.f32 %v1764_v43, %v1763_v9 }
 0x42a   : > { %v1766_v2 = vrot.slane %v1765_v14, 1 }
 0x42c   : > { %v1767_v33 = vadd.f32 %v1766_v2, %v1765_v14  ;;  %v2419_v2 = vld [vmem:[%s4486_s7 + $0x28] sm:$0xff] }
 0x4b5   : > { %v2235_v4 = vpop.xlane.xlu0 %2234 }
 0x4b6   : > { %3361 = vrcp.f32 %v2235_v4 }
 0x4be   : > { %v1853_v62 = vpop.f32.mrb[0].mxu1 }
 0x4bf   : > { %v1858_v54 = vrot.slane %v1853_v62, 1  ;;  %v1873_v22 = vadd.f32 %v1853_v62, %v1718_v45  ;;  %v3073_v52 = vpop.f32.mrb[1].mxu1  ;;  %v1860_v12 = vrot.slane %v1853_v62, 3  ;;  %v1861_v4 = vrot.slane %v1853_v62, 4  ;;  %v2416_v45 = vld [vmem:[%s4486_s7 + $0x10] sm:$0xff] }
 0x4c0   : > { %v3362_v21 = vpop.eup %3361  ;;  %v1862_v18 = vrot.slane %v1853_v62, 5  ;;  %v1864_v49 = vrot.slane %v1853_v62, 7 }
 0x4c1   : > { %v4191_v48 = vmul.f32 %v3362_v21, %v3360_v38  ;;  %v1859_v38 = vrot.slane %v1853_v62, 2  ;;  %v1874_v31 = vadd.f32 %v1858_v54, %v1725_v23  ;;  %v1876_v9 = vadd.f32 %v1860_v12, %v1739_v29  ;;  %v2417_v23 = vld [vmem:[%s4486_s7 + $0x18] sm:$0xff] }
 0x4c2   : > { %v1877_v19 = vadd.f32 %v1861_v4, %v1746_v56  ;;  %v1878_v47 = vadd.f32 %v1862_v18, %v1753_v53  ;;  %v1880_v28 = vadd.f32 %v1864_v49, %v1767_v33  ;;  %v3242_v21 = vpack.c.bf16 %v2415_v63, %v2414_v58  ;;  %v2418_v56 = vld [vmem:[%s4486_s7 + $0x20] sm:$0xff]  ;;  %v2425_v12 = vld [vmem:[%s4486_s7 + $0x58] sm:$0xff]  ;;  %v2634_v63 = vld [vmem:[%s4488_s9 + $0x48] sm:$0xff] }
 0x4c3   : > { %v2241_v61 = vrot.slane %v4191_v48, %v3475_v11  ;;  %v2252_v36 = vrot.slane %v4191_v48, %v3472_v10  ;;  %v1863_v11 = vrot.slane %v1853_v62, 6  ;;  %v1875_v16 = vadd.f32 %v1859_v38, %v1732_v32  ;;  %v2421_v62 = vld [vmem:[%s4486_s7 + $0x38] sm:$0xff]  ;;  %v2423_v38 = vld [vmem:[%s4486_s7 + $0x48] sm:$0xff]  ;;  %v2426_v18 = vld [vmem:[%s4486_s7 + $0x60] sm:$0xff] }
 0x4c4   : > { %v2524_v10 = vrot.slane %v1874_v31, 7  ;;  %v2263_v51 = vrot.slane %v4191_v48, %v3502_v20  ;;  %v2528_v43 = vrot.slane %v1876_v9, 5  ;;  %v2530_v41 = vrot.slane %v1877_v19, 4  ;;  %3243 = vmatpush3.bf16.msra.mxu1 %v3242_v21  ;;  %v2429_v49 = vld [vmem:[%s4486_s7 + $0x78] sm:$0xff]  ;;  %v2625_v31 = vld [vmem:[%s4488_s9] sm:$0xff]  ;;  %v2627_v9 = vld [vmem:[%s4488_s9 + $0x10] sm:$0xff] }
 0x4c5   : > { %2247 = vbcast.lane.b32.xlu1 %v2241_v61, 264  ;;  %2243 = vbcast.lane.b32.xlu0 %v2241_v61, 256  ;;  %v1879_v15 = vadd.f32 %v1863_v11, %v1760_v60  ;;  %v2526_v8 = vrot.slane %v1875_v16, 6  ;;  %v2532_v20 = vrot.slane %v1878_v47, 3  ;;  %v2274_v42 = vrot.slane %v4191_v48, %v3514_v25  ;;  %v2428_v11 = vld [vmem:[%s4486_s7 + $0x70] sm:$0xff]  ;;  %v2626_v16 = vld [vmem:[%s4488_s9 + $0x8] sm:$0xff] }
 0x4c6   : > { %v2525_v37 = vsel %vm1493_vm7, %v2524_v10, %v1873_v22  ;;  %v2536_v7 = vrot.slane %v1880_v28, 1  ;;  %3244 = vmatprep.subr.bf16.mxu1 %v4562_v39  ;;  %v3245_v25 = vpack.c.bf16 %v2417_v23, %v2416_v45  ;;  %v2285_v29 = vrot.slane %v4191_v48, %v3526_v30  ;;  %v2420_v30 = vld [vmem:[%s4486_s7 + $0x30] sm:$0xff]  ;;  %v2628_v47 = vld [vmem:[%s4488_s9 + $0x18] sm:$0xff]  ;;  %v2629_v28 = vld [vmem:[%s4488_s9 + $0x20] sm:$0xff] }
 0x4c7   : > { %v2527_v24 = vsel %vm1495_vm8, %v2526_v8, %v2525_v37  ;;  %v2534_v14 = vrot.slane %v1879_v15, 2  ;;  %v3248_v53 = vpack.c.bf16 %v2419_v2, %v2418_v56  ;;  %v2296_v60 = vrot.slane %v4191_v48, %v3538_v35  ;;  %v2422_v35 = vld [vmem:[%s4486_s7 + $0x40] sm:$0xff]  ;;  %v2630_v10 = vld [vmem:[%s4488_s9 + $0x28] sm:$0xff]  ;;  %v2632_v37 = vld [vmem:[%s4488_s9 + $0x38] sm:$0xff] }
 0x4c8   : > { %v2529_v34 = vsel %vm1497_vm11, %v2528_v43, %v2527_v24  ;;  %3246 = vmatpush3.bf16.msra.mxu1 %v3245_v25  ;;  %v2307_v54 = vrot.slane %v4191_v48, %v3554_v40  ;;  %v3254_v22 = vpack.c.bf16 %v2423_v38, %v2422_v35  ;;  %v2318_v52 = vrot.slane %v4191_v48, %v3560_v44  ;;  %v2424_v40 = vld [vmem:[%s4486_s7 + $0x50] sm:$0xff]  ;;  %v2427_v44 = vld [vmem:[%s4486_s7 + $0x68] sm:$0xff]  ;;  %v2633_v58 = vld [vmem:[%s4488_s9 + $0x40] sm:$0xff] }
 0x4c9   : > { %2254 = vbcast.lane.b32.xlu1 %v2252_v36, 256  ;;  %2258 = vbcast.lane.b32.xlu0 %v2252_v36, 264  ;;  %v2531_v50 = vsel %vm1499_vm12, %v2530_v41, %v2529_v34  ;;  %v3251_v36 = vpack.c.bf16 %v2421_v62, %v2420_v30  ;;  %v3257_v4 = vpack.c.bf16 %v2425_v12, %v2424_v40  ;;  %v2635_v41 = vld [vmem:[%s4488_s9 + $0x50] sm:$0xff]  ;;  %v2636_v21 = vld [vmem:[%s4488_s9 + $0x58] sm:$0xff]  ;;  %v2609_v45 = vld [vmem:[%s4487_s8] sm:$0xff] }
 0x4ca   : > { %v2533_v6 = vsel %vm1501_vm13, %v2532_v20, %v2531_v50  ;;  %3247 = vmatprep.subr.bf16.mxu1 %v4562_v39  ;;  %v3260_v48 = vpack.c.bf16 %v2427_v44, %v2426_v18  ;;  %v3263_v33 = vpack.c.bf16 %v2429_v49, %v2428_v11  ;;  %v3290_v19 = vpack.c.bf16 %v2626_v16, %v2625_v31  ;;  %v2637_v20 = vld [vmem:[%s4488_s9 + $0x60] sm:$0xff]  ;;  %v2610_v23 = vld [vmem:[%s4487_s8 + $0x8] sm:$0xff]  ;;  %v2612_v56 = vld [vmem:[%s4487_s8 + $0x18] sm:$0xff] }
 0x4cb   : > { %v2535_v61 = vsel %vm1503_vm10, %v2534_v14, %v2533_v6  ;;  %v3293_v15 = vpack.c.bf16 %v2628_v47, %v2627_v9  ;;  %v3296_v8 = vpack.c.bf16 %v2630_v10, %v2629_v28  ;;  %v3302_v24 = vpack.c.bf16 %v2634_v63, %v2633_v58  ;;  %v2639_v14 = vld [vmem:[%s4488_s9 + $0x70] sm:$0xff]  ;;  %v2640_v6 = vld [vmem:[%s4488_s9 + $0x78] sm:$0xff]  ;;  %v2617_v35 = vld [vmem:[%s4487_s8 + $0x40] sm:$0xff] }
 0x4cc   : > { %v4221_v32 = vsel %vm1505_vm3, %v2536_v7, %v2535_v61  ;;  %3249 = vmatpush3.bf16.msra.mxu1 %v3248_v53  ;;  %3291 = vmatpush3.bf16.msra.mxu0 %v3290_v19  ;;  %v3305_v34 = vpack.c.bf16 %v2636_v21, %v2635_v41  ;;  %v3311_v7 = vpack.c.bf16 %v2640_v6, %v2639_v14  ;;  %v449_v61 = vld [vmem:[%s409_s25] sm:$0xff]  ;;  %v2615_v62 = vld [vmem:[%s4487_s8 + $0x30] sm:$0xff]  ;;  %v2618_v38 = vld [vmem:[%s4487_s8 + $0x48] sm:$0xff] }
 0x4cd   : > { %2265 = vbcast.lane.b32.xlu1 %v2263_v51, 256  ;;  %2269 = vbcast.lane.b32.xlu0 %v2263_v51, 264  ;;  %v2631_v51 = vld [vmem:[%s4488_s9 + $0x30] sm:$0xff]  ;;  %v3314_v25 = vpack.c.bf16 %v2610_v23, %v2609_v45  ;;  %v2613_v53 = vld [vmem:[%s4487_s8 + $0x20] sm:$0xff]  ;;  %v2620_v40 = vld [vmem:[%s4487_s8 + $0x58] sm:$0xff] }
 0x4ce   : > { %3250 = vmatprep.subr.bf16.mxu1 %v4562_v39  ;;  %3292 = vmatprep.subr.bf16.mxu0 %v4562_v39  ;;  %v3299_v43 = vpack.c.bf16 %v2632_v37, %v2631_v51  ;;  %v2621_v44 = vld [vmem:[%s4487_s8 + $0x60] sm:$0xff]  ;;  %v2623_v31 = vld [vmem:[%s4487_s8 + $0x70] sm:$0xff]  ;;  %v2624_v16 = vld [vmem:[%s4487_s8 + $0x78] sm:$0xff] }
 0x4cf   : > { %v3335_v37 = vpack.c.bf16 %v2624_v16, %v2623_v31 }
 0x4d0   : > { %3252 = vmatpush3.bf16.msra.mxu1 %v3251_v36  ;;  %3294 = vmatpush3.bf16.msra.mxu0 %v3293_v15  ;;  %v2616_v36 = vld [vmem:[%s4487_s8 + $0x38] sm:$0xff] }
 0x4d1   : > { %2276 = vbcast.lane.b32.xlu1 %v2274_v42, 256  ;;  %2280 = vbcast.lane.b32.xlu0 %v2274_v42, 264  ;;  %v2638_v42 = vld [vmem:[%s4488_s9 + $0x68] sm:$0xff] }
 0x4d2   : > { %3253 = vmatprep.subr.bf16.mxu1 %v4562_v39  ;;  %3295 = vmatprep.subr.bf16.mxu0 %v4562_v39  ;;  %v3308_v50 = vpack.c.bf16 %v2638_v42, %v2637_v20  ;;  %v4579_v42 = vld [vmem:[#allocation2_spill] sm:$0xff] }
 0x4d4   : > { %3255 = vmatpush3.bf16.msra.mxu1 %v3254_v22  ;;  %3297 = vmatpush3.bf16.msra.mxu0 %v3296_v8  ;;  %v3326_v22 = vpack.c.bf16 %v2618_v38, %v2617_v35 }
 0x4d5   : > { %2287 = vbcast.lane.b32.xlu1 %v2285_v29, 256  ;;  %2291 = vbcast.lane.b32.xlu0 %v2285_v29, 264  ;;  %v2611_v29 = vld [vmem:[%s4487_s8 + $0x10] sm:$0xff] }
 0x4d6   : > { %3256 = vmatprep.subr.bf16.mxu1 %v4562_v39  ;;  %3298 = vmatprep.subr.bf16.mxu0 %v4562_v39  ;;  %v3317_v2 = vpack.c.bf16 %v2612_v56, %v2611_v29 }
 0x4d8   : > { %3258 = vmatpush3.bf16.msra.mxu1 %v3257_v4  ;;  %3300 = vmatpush3.bf16.msra.mxu0 %v3299_v43 }
 0x4d9   : > { %2298 = vbcast.lane.b32.xlu1 %v2296_v60, 256  ;;  %2302 = vbcast.lane.b32.xlu0 %v2296_v60, 264  ;;  %v2614_v60 = vld [vmem:[%s4487_s8 + $0x28] sm:$0xff] }
 0x4da   : > { %3259 = vmatprep.subr.bf16.mxu1 %v4562_v39  ;;  %3301 = vmatprep.subr.bf16.mxu0 %v4562_v39  ;;  %v3320_v30 = vpack.c.bf16 %v2614_v60, %v2613_v53 }
 0x4dc   : > { %3261 = vmatpush3.bf16.msra.mxu1 %v3260_v48  ;;  %3303 = vmatpush3.bf16.msra.mxu0 %v3302_v24  ;;  %v2622_v48 = vld [vmem:[%s4487_s8 + $0x68] sm:$0xff] }
 0x4dd   : > { %2309 = vbcast.lane.b32.xlu1 %v2307_v54, 256  ;;  %2313 = vbcast.lane.b32.xlu0 %v2307_v54, 264  ;;  %v3323_v54 = vpack.c.bf16 %v2616_v36, %v2615_v62 }
 0x4de   : > { %3262 = vmatprep.subr.bf16.mxu1 %v4562_v39  ;;  %3304 = vmatprep.subr.bf16.mxu0 %v4562_v39 }
 0x4e0   : > { %3264 = vmatpush3.bf16.msra.mxu1 %v3263_v33  ;;  %3306 = vmatpush3.bf16.msra.mxu0 %v3305_v34  ;;  %v3332_v33 = vpack.c.bf16 %v2622_v48, %v2621_v44 }
 0x4e1   : > { %2320 = vbcast.lane.b32.xlu1 %v2318_v52, 256  ;;  %2324 = vbcast.lane.b32.xlu0 %v2318_v52, 264  ;;  %v2619_v52 = vld [vmem:[%s4487_s8 + $0x50] sm:$0xff] }
 0x4e2   : > { %3265 = vmatprep.subr.bf16.mxu1 %v4562_v39  ;;  %3307 = vmatprep.subr.bf16.mxu0 %v4562_v39  ;;  %v3329_v18 = vpack.c.bf16 %v2620_v40, %v2619_v52  ;;  %v4583_v40 = vld [vmem:[#allocation7_spill] sm:$0xff] }
 0x4e4   : > { %3309 = vmatpush3.bf16.msra.mxu0 %v3308_v50 }
 0x4e5   : > { %3310 = vmatprep.subr.bf16.mxu0 %v4562_v39 }
 0x4e8   : > { %3312 = vmatpush3.bf16.msra.mxu0 %v3311_v7 }
 0x4e9   : > { %3313 = vmatprep.subr.bf16.mxu0 %v4562_v39 }
 0x4eb   : > { %3177 = vmatmul.mubr.f32.vlgmr.msra.gmra.mrb[2].mxu0 %v449_v61 }
 0x4ec   : > { %3315 = vmatpush3.bf16.msra.mxu0 %v3314_v25  ;;  %3211 = vmatprep.mubr.msk.f32.mxu0 %vm3374_vm0, %v4556_v59 }
 0x4ed   : > { %3316 = vmatprep.subr.bf16.mxu0 %v4562_v39 }
 0x4f0   : > { %3318 = vmatpush3.bf16.msra.mxu0 %v3317_v2  ;;  %v4581_v2 = vld [vmem:[#allocation4_spill] sm:$0xff] }
 0x4f1   : > { %3319 = vmatprep.subr.bf16.mxu0 %v4562_v39 }
 0x4f4   : > { %3321 = vmatpush3.bf16.msra.mxu0 %v3320_v30 }
 0x4f5   : > { %3322 = vmatprep.subr.bf16.mxu0 %v4562_v39 }
 0x4f8   : > { %3324 = vmatpush3.bf16.msra.mxu0 %v3323_v54 }
 0x4f9   : > { %3325 = vmatprep.subr.bf16.mxu0 %v4562_v39 }
 0x4fc   : > { %3327 = vmatpush3.bf16.msra.mxu0 %v3326_v22  ;;  %v4582_v22 = vld [vmem:[#allocation5_spill] sm:$0xff] }
 0x4fd   : > { %3328 = vmatprep.subr.bf16.mxu0 %v4562_v39 }
 0x500   : > { %3330 = vmatpush3.bf16.msra.mxu0 %v3329_v18 }
 0x501   : > { %3331 = vmatprep.subr.bf16.mxu0 %v4562_v39 }
 0x504   : > { %3333 = vmatpush3.bf16.msra.mxu0 %v3332_v33 }
 0x505   : > { %3334 = vmatprep.subr.bf16.mxu0 %v4562_v39 }
 0x508   : > { %3336 = vmatpush3.bf16.msra.mxu0 %v3335_v37 }
 0x537   : > { %v2248_v12 = vpop.permute.xlu1 %2247  ;;  %v2244_v4 = vpop.permute.xlu0 %2243 }
 0x538   : > { %v2327_v47 = vmul.f32 %v3743_v55, %v2248_v12  ;;  %v2326_v15 = vmul.f32 %v3738_v46, %v2244_v4 }
 0x53a   : > { %v2342_v58 = vadd.f32 %v2327_v47, %v2326_v15 }
 0x53b   : > { %v2255_v11 = vpop.permute.xlu1 %2254  ;;  %v2259_v49 = vpop.permute.xlu0 %2258 }
 0x53c   : > { %v2328_v9 = vmul.f32 %v3746_v57, %v2255_v11  ;;  %v2329_v19 = vmul.f32 %v3753_v0, %v2259_v49  ;;  %v2343_v41 = vrot.slane %v2342_v58, 4 }
 0x53e   : > { %v2349_v43 = vadd.f32 %v2329_v19, %v2328_v9  ;;  %v2344_v45 = vadd.f32 %v2343_v41, %v2342_v58 }
 0x53f   : > { %v2266_v28 = vpop.permute.xlu1 %2265  ;;  %v2270_v10 = vpop.permute.xlu0 %2269 }
 0x540   : > { %v2330_v8 = vmul.f32 %v3756_v5, %v2266_v28  ;;  %v2331_v51 = vmul.f32 %v3762_v13, %v2270_v10  ;;  %v2350_v55 = vrot.slane %v2349_v43, 4  ;;  %v2345_v62 = vrot.slane %v2344_v45, 2 }
 0x542   : > { %v2356_v63 = vadd.f32 %v2331_v51, %v2330_v8  ;;  %v2351_v6 = vadd.f32 %v2350_v55, %v2349_v43  ;;  %v2346_v11 = vadd.f32 %v2345_v62, %v2344_v45 }
 0x543   : > { %v2277_v57 = vpop.permute.xlu1 %2276  ;;  %v2281_v24 = vpop.permute.xlu0 %2280 }
 0x544   : > { %v2332_v0 = vmul.f32 %v3765_v17, %v2277_v57  ;;  %v2333_v46 = vmul.f32 %v3771_v1, %v2281_v24  ;;  %v2357_v21 = vrot.slane %v2356_v63, 4  ;;  %v4580_v1 = vld [vmem:[#allocation3_spill] sm:$0xff]  ;;  %v2352_v60 = vrot.slane %v2351_v6, 2 }
 0x546   : > { %v2363_v5 = vadd.f32 %v2333_v46, %v2332_v0  ;;  %v2358_v23 = vadd.f32 %v2357_v21, %v2356_v63  ;;  %v2353_v44 = vadd.f32 %v2352_v60, %v2351_v6  ;;  %v2347_v63 = vrot.slane %v2346_v11, 1  ;;  %v2400_v60 = vld [vmem:[%s4485_s6 + $0x10] sm:$0xff] }
 0x547   : > { %v2288_v34 = vpop.permute.xlu1 %2287  ;;  %v2292_v13 = vpop.permute.xlu0 %2291 }
 0x548   : > { %v2334_v20 = vmul.f32 %v3774_v27, %v2288_v34  ;;  %v2335_v50 = vmul.f32 %v4579_v42, %v2292_v13  ;;  %v2364_v14 = vrot.slane %v2363_v5, 4  ;;  %v2359_v36 = vrot.slane %v2358_v23, 2 }
 0x549   : > { %v2354_v8 = vrot.slane %v2353_v44, 1 }
 0x54a   : > { %v2370_v7 = vadd.f32 %v2335_v50, %v2334_v20  ;;  %v2365_v25 = vadd.f32 %v2364_v14, %v2363_v5  ;;  %v2360_v49 = vadd.f32 %v2359_v36, %v2358_v23  ;;  %v2398_v23 = vld [vmem:[%s4485_s6] sm:$0xff] }
 0x54b   : > { %v2299_v61 = vpop.permute.xlu1 %2298  ;;  %v2303_v17 = vpop.permute.xlu0 %2302  ;;  %v2355_v55 = vadd.f32 %v2354_v8, %v2353_v44 }
 0x54c   : > { %v2371_v29 = vrot.slane %v2370_v7, 4  ;;  %v2336_v56 = vmul.f32 %v4580_v1, %v2299_v61  ;;  %v2337_v53 = vmul.f32 %v4581_v2, %v2303_v17  ;;  %v2366_v38 = vrot.slane %v2365_v25, 2  ;;  %v2399_v61 = vld [vmem:[%s4485_s6 + $0x8] sm:$0xff] }
 0x54d   : > { %v2361_v43 = vrot.slane %v2360_v49, 1  ;;  %v3266_v2 = vpack.c.bf16 %v2399_v61, %v2398_v23 }
 0x54e   : > { %v2372_v30 = vadd.f32 %v2371_v29, %v2370_v7  ;;  %v2377_v27 = vadd.f32 %v2337_v53, %v2336_v56  ;;  %v2367_v9 = vadd.f32 %v2366_v38, %v2365_v25  ;;  %v2404_v38 = vld [vmem:[%s4485_s6 + $0x30] sm:$0xff] }
 0x54f   : > { %v2310_v54 = vpop.permute.xlu1 %2309  ;;  %v2314_v35 = vpop.permute.xlu0 %2313  ;;  %v2362_v34 = vadd.f32 %v2361_v43, %v2360_v49 }
 0x550   : > { %v2338_v52 = vmul.f32 %v4582_v22, %v2310_v54  ;;  %v2339_v12 = vmul.f32 %v4583_v40, %v2314_v35  ;;  %v2373_v4 = vrot.slane %v2372_v30, 2  ;;  %v2378_v18 = vrot.slane %v2377_v27, 4  ;;  %v2403_v54 = vld [vmem:[%s4485_s6 + $0x28] sm:$0xff] }
 0x551   : > { %v2368_v57 = vrot.slane %v2367_v9, 1  ;;  %v2407_v40 = vld [vmem:[%s4485_s6 + $0x48] sm:$0xff] }
 0x552   : > { %v2384_v48 = vadd.f32 %v2339_v12, %v2338_v52  ;;  %v2379_v33 = vadd.f32 %v2378_v18, %v2377_v27  ;;  %v2374_v28 = vadd.f32 %v2373_v4, %v2372_v30  ;;  %v2401_v30 = vld [vmem:[%s4485_s6 + $0x18] sm:$0xff]  ;;  %v2402_v27 = vld [vmem:[%s4485_s6 + $0x20] sm:$0xff]  ;;  %v2408_v4 = vld [vmem:[%s4485_s6 + $0x50] sm:$0xff] }
 0x553   : > { %v2321_v31 = vpop.permute.xlu1 %2320  ;;  %v2325_v16 = vpop.permute.xlu0 %2324  ;;  %v2369_v13 = vadd.f32 %v2368_v57, %v2367_v9  ;;  %v3269_v36 = vpack.c.bf16 %v2401_v30, %v2400_v60  ;;  %v3272_v35 = vpack.c.bf16 %v2403_v54, %v2402_v27  ;;  %v2406_v52 = vld [vmem:[%s4485_s6 + $0x40] sm:$0xff]  ;;  %v2409_v18 = vld [vmem:[%s4485_s6 + $0x58] sm:$0xff] }
 0x554   : > { %v2385_v19 = vrot.slane %v2384_v48, 4  ;;  %v2340_v47 = vmul.f32 %v4561_v3, %v2321_v31  ;;  %v2341_v15 = vmul.f32 %v4560_v26, %v2325_v16  ;;  %v2380_v10 = vrot.slane %v2379_v33, 2  ;;  %v2413_v31 = vld [vmem:[%s4485_s6 + $0x78] sm:$0xff] }
 0x555   : > { %v2375_v46 = vrot.slane %v2374_v28, 1  ;;  %v2348_v3 = vadd.f32 %v2347_v63, %v2346_v11  ;;  %v3278_v12 = vpack.c.bf16 %v2407_v40, %v2406_v52  ;;  %v3281_v44 = vpack.c.bf16 %v2409_v18, %v2408_v4  ;;  %v2411_v11 = vld [vmem:[%s4485_s6 + $0x68] sm:$0xff] }
 0x556   : > { %v2386_v51 = vadd.f32 %v2385_v19, %v2384_v48  ;;  %v2391_v37 = vadd.f32 %v2341_v15, %v2340_v47  ;;  %v2381_v58 = vadd.f32 %v2380_v10, %v2379_v33  ;;  %v2410_v48 = vld [vmem:[%s4485_s6 + $0x60] sm:$0xff]  ;;  %v2412_v33 = vld [vmem:[%s4485_s6 + $0x70] sm:$0xff] }
 0x557   : > { %v2376_v42 = vadd.f32 %v2375_v46, %v2374_v28  ;;  %v2438_v50 = vsel %vm1493_vm7, %v2355_v55, %v2348_v3  ;;  %v3284_v49 = vpack.c.bf16 %v2411_v11, %v2410_v48  ;;  %v3287_v16 = vpack.c.bf16 %v2413_v31, %v2412_v33 }
 0x558   : > { %v2387_v24 = vrot.slane %v2386_v51, 2  ;;  %v2392_v0 = vrot.slane %v2391_v37, 4  ;;  %v2382_v41 = vrot.slane %v2381_v58, 1  ;;  %v2439_v7 = vsel %vm1495_vm8, %v2362_v34, %v2438_v50 }
 0x559   : > { %v2440_v25 = vsel %vm1497_vm11, %v2369_v13, %v2439_v7 }
 0x55a   : > { %v2388_v21 = vadd.f32 %v2387_v24, %v2386_v51  ;;  %v2393_v5 = vadd.f32 %v2392_v0, %v2391_v37  ;;  %v2383_v14 = vadd.f32 %v2382_v41, %v2381_v58  ;;  %v2441_v29 = vsel %vm1499_vm12, %v2376_v42, %v2440_v25 }
 0x55c   : > { %v2389_v26 = vrot.slane %v2388_v21, 1  ;;  %v2394_v20 = vrot.slane %v2393_v5, 2  ;;  %v2442_v56 = vsel %vm1501_vm13, %v2383_v14, %v2441_v29 }
 0x55e   : > { %v2395_v6 = vadd.f32 %v2394_v20, %v2393_v5  ;;  %v2390_v45 = vadd.f32 %v2389_v26, %v2388_v21 }
 0x560   : > { %v2396_v17 = vrot.slane %v2395_v6, 1  ;;  %v2443_v53 = vsel %vm1503_vm10, %v2390_v45, %v2442_v56 }
 0x562   : > { %v2397_v1 = vadd.f32 %v2396_v17, %v2395_v6 }
 0x564   : > { %v2444_v62 = vsel %vm1505_vm3, %v2397_v1, %v2443_v53 }
 0x565   : > { %3107 = vmatmul.mubr.f32.vlgmr.msra.gmra.mrb[2].mxu1 %v2444_v62 }
 0x566   : > { %3267 = vmatpush3.bf16.msra.mxu1 %v3266_v2  ;;  %3141 = vmatprep.mubr.msk.f32.mxu1 %vm3374_vm0, %v4556_v59  ;;  %v2405_v59 = vld [vmem:[%s4485_s6 + $0x38] sm:$0xff] }
 0x567   : > { %3268 = vmatprep.subr.bf16.mxu1 %v4562_v39  ;;  %v3275_v22 = vpack.c.bf16 %v2405_v59, %v2404_v38 }
 0x56a   : > { %3270 = vmatpush3.bf16.msra.mxu1 %v3269_v36 }
 0x56b   : > { %3271 = vmatprep.subr.bf16.mxu1 %v4562_v39 }
 0x56e   : > { %3273 = vmatpush3.bf16.msra.mxu1 %v3272_v35 }
 0x56f   : > { %3274 = vmatprep.subr.bf16.mxu1 %v4562_v39 }
 0x572   : > { %3276 = vmatpush3.bf16.msra.mxu1 %v3275_v22 }
 0x573   : > { %3277 = vmatprep.subr.bf16.mxu1 %v4562_v39 }
 0x576   : > { %3279 = vmatpush3.bf16.msra.mxu1 %v3278_v12 }
 0x577   : > { %3280 = vmatprep.subr.bf16.mxu1 %v4562_v39 }
 0x57a   : > { %3282 = vmatpush3.bf16.msra.mxu1 %v3281_v44 }
 0x57b   : > { %3283 = vmatprep.subr.bf16.mxu1 %v4562_v39 }
 0x57e   : > { %3285 = vmatpush3.bf16.msra.mxu1 %v3284_v49 }
 0x57f   : > { %3286 = vmatprep.subr.bf16.mxu1 %v4562_v39 }
 0x582   : > { %3288 = vmatpush3.bf16.msra.mxu1 %v3287_v16 }
 0x585   : > { %3142 = vmatmul.mubr.f32.vlgmr.msra.gmra.mrb[2].mxu1 %v4221_v32 }
 0x658   : > { %v2605_v9 = vpop.f32.mrb[2].mxu1 }
 0x659   : > { %v3143_v19 = vpop.f32.mrb[3].mxu1  ;;  %3212 = vmatmul.mubr.f32.vlgmr.msra.gmra.mrb[2].mxu0 %v2605_v9 }
 0x72c   : > { %v2777_v47 = vpop.f32.mrb[2].mxu0 }
 0x72d   : > { %3363 = vtanh.f32 %v2777_v47  ;;  %v3213_v15 = vpop.f32.mrb[3].mxu0 }
 0x737   : > { %v3364_v28 = vpop.eup %3363 }
 0x738   : > { %2782 = vst [vmem:[%s413_s20] sm:$0xff] %v3364_v28 }
 0x739 PF: > { %s20_s13 = sadd.s32 1, %s3371_s13  }
 0x73a   : > { %p17_p5 = scmp.ge.s32.totalorder %s20_s13, 4  }
 0x73c   :  { %19 = sbr.rel (!%p17_p5) target bundleno = 1 (0x1), region = 99 }

</bundles_post_ra>
